<compile_context>
chip_gen: v7x
topology: tpu7x:2x2x1
jax: 0.10.0
libtpu: 0.0.40
codegen_flags: <defaults>
</compile_context>

<pallas_src>
import functools

import jax
import jax.numpy as jnp
from jax.experimental import pallas as pl
from jax.experimental.pallas import tpu as pltpu


def _round_up(x, m):
    return ((x + m - 1) // m) * m


def _supcon_kernel(a_lab_ref, c_lab_ref, a_feat_ref, c_feat_ref, out_ref,
                   m_sc, l_sc, ps_sc, cnt_sc, t_sc, *,
                   inv_temperature, loss_scale, n_valid_cols, block_m, block_k):
    """One (row_tile, col_tile) step of the SupCon forward.

    a_lab_ref : [TM, 1] int32   anchor labels
    c_lab_ref : [1, TK] int32   contrast labels
    a_feat_ref: [TM, D] f32/bf16 anchor features
    c_feat_ref: [TK, D] f32/bf16 contrast features
    out_ref   : [TM, 1] f32     per-anchor loss (written on last col step)
    scratch   : five [TM, 1] f32 accumulators
    """
    i = pl.program_id(0)
    j = pl.program_id(1)
    n_col_tiles = pl.num_programs(1)

    @pl.when(j == 0)
    def _init():
        m_sc[...] = jnp.full_like(m_sc, -jnp.inf)
        l_sc[...] = jnp.zeros_like(l_sc)
        ps_sc[...] = jnp.zeros_like(ps_sc)
        cnt_sc[...] = jnp.zeros_like(cnt_sc)

    # Fold 1/T into the anchor tile once (O(TM*D)) instead of scaling the
    # O(TM*TK) score tile.  Keep the scale in f32, cast back to the matmul dtype.
    xa = (a_feat_ref[...].astype(jnp.float32) * inv_temperature).astype(a_feat_ref.dtype)
    xc = c_feat_ref[...]
    # A @ C^T via dot_general contracting dim 1 of both operands (MXU-native,
    # no explicit transpose of the contrast tile).  Accumulate in f32.
    s = jax.lax.dot_general(xa, xc, (((1,), (1,)), ((), ())),
                            preferred_element_type=jnp.float32)        # [TM, TK]

    # Online (flash-style) softmax statistics.
    m_prev = m_sc[...]
    m_new = jnp.maximum(m_prev, jnp.max(s, axis=1, keepdims=True))     # [TM, 1]
    alpha = jnp.exp(m_prev - m_new)
    exp_s = jnp.exp(s - m_new)                                         # [TM, TK]

    # Positive-pair mask built from label vectors (no [N, N] mask input).
    pos = (a_lab_ref[...] == c_lab_ref[...]).astype(jnp.float32)       # [TM, TK]

    # Unmasked per-tile contributions (exact for tiles that neither touch the
    # diagonal nor contain padded columns — the vast majority).
    t_sc[...] = jnp.sum(exp_s, axis=1, keepdims=True)
    ps_sc[...] = ps_sc[...] + jnp.sum(pos * s, axis=1, keepdims=True)
    cnt_sc[...] = cnt_sc[...] + jnp.sum(pos, axis=1, keepdims=True)

    row0 = i * block_m
    col0 = j * block_k
    touches_diag = jnp.logical_and(row0 < col0 + block_k, col0 < row0 + block_m)
    has_pad_cols = (col0 + block_k) > n_valid_cols

    @pl.when(jnp.logical_or(touches_diag, has_pad_cols))
    def _mask_corrections():
        rid = row0 + jax.lax.broadcasted_iota(jnp.int32, (block_m, block_k), 0)
        cid = col0 + jax.lax.broadcasted_iota(jnp.int32, (block_m, block_k), 1)
        keep = jnp.logical_and(rid != cid, cid < n_valid_cols).astype(jnp.float32)
        # Recompute the denominator partial with the mask applied BEFORE the sum:
        # the dropped diagonal term exp(0) dominates the rest at small T, so an
        # add-then-subtract correction would cancel catastrophically.
        t_sc[...] = jnp.sum(exp_s * keep, axis=1, keepdims=True)
        dropped = pos * (1.0 - keep)
        ps_sc[...] = ps_sc[...] - jnp.sum(dropped * s, axis=1, keepdims=True)
        cnt_sc[...] = cnt_sc[...] - jnp.sum(dropped, axis=1, keepdims=True)

    l_sc[...] = alpha * l_sc[...] + t_sc[...]
    m_sc[...] = m_new

    @pl.when(j == n_col_tiles - 1)
    def _finalize():
        cnt = cnt_sc[...]
        safe_cnt = jnp.where(cnt > 0.0, cnt, 1.0)
        # sum(pos * logits)/cnt - log(sum exp(logits)) with logits = s - m:
        #   = sum(pos*s)/cnt - m - log(l)
        mean_log_prob_pos = ps_sc[...] / safe_cnt - m_sc[...] - jnp.log(l_sc[...])
        per_row = -loss_scale * mean_log_prob_pos
        # Guard anchors with zero positives (reference would produce NaN).
        out_ref[...] = jnp.where(cnt > 0.0, per_row, 0.0)


def supcon_loss(features, labels=None, mask=None, *, temperature=0.07,
                contrast_mode="all", base_temperature=0.07,
                block_m=256, block_k=512, matmul_dtype=jnp.bfloat16):
    """JAX/Pallas equivalent of SupConLoss.forward (modes 'all' and 'one')."""
    if features.ndim < 3:
        raise ValueError("`features` needs to be [bsz, n_views, ...]")
    if features.ndim > 3:
        features = features.reshape(features.shape[0], features.shape[1], -1)
    bsz, n_views, dim = features.shape

    if labels is not None and mask is not None:
        raise ValueError("Cannot define both `labels` and `mask`")
    if mask is not None:
        # TODO(synk): arbitrary user-supplied [bsz, bsz] masks are not expressible
        # as a label vector; would need an int8 tiled-mask kernel variant.
        raise NotImplementedError("explicit `mask` path not implemented in the Pallas kernel")
    if labels is None:
        ids = jnp.arange(bsz, dtype=jnp.int32)
    else:
        labels = jnp.asarray(labels).reshape(-1)
        if labels.shape[0] != bsz:
            raise ValueError("Num of labels does not match num of features")
        ids = labels.astype(jnp.int32)

    # contrast_feature = cat(unbind(features, dim=1), dim=0): view-major stack.
    n_contrast = bsz * n_views
    contrast_feature = jnp.transpose(features, (1, 0, 2)).reshape(n_contrast, dim)
    contrast_labels = jnp.tile(ids, n_views)

    if contrast_mode == "all":
        anchor_feature = contrast_feature
        anchor_labels = contrast_labels
    elif contrast_mode == "one":
        anchor_feature = features[:, 0]
        anchor_labels = ids
    else:
        raise ValueError(f"Unknown mode: {contrast_mode}")

    m_rows = anchor_feature.shape[0]
    n_cols = contrast_feature.shape[0]

    # Tile sizes / padding: lane-aligned D, (8,128)-friendly row/col tiles.
    d_pad = _round_up(dim, 128)
    tm = min(block_m, _round_up(m_rows, 128))
    tk = min(block_k, _round_up(n_cols, 128))
    m_pad = _round_up(m_rows, tm)
    n_pad = _round_up(n_cols, tk)
    itemsize = jnp.dtype(matmul_dtype).itemsize

    def _pad_feat(x, rows):
        x = x.astype(jnp.float32)
        x = jnp.pad(x, ((0, rows - x.shape[0]), (0, d_pad - x.shape[1])))
        return x.astype(matmul_dtype)

    a_feat = _pad_feat(anchor_feature, m_pad)
    c_feat = _pad_feat(contrast_feature, n_pad)
    a_lab = jnp.pad(anchor_labels.astype(jnp.int32), (0, m_pad - m_rows),
                    constant_values=-1).reshape(m_pad, 1)
    c_lab = jnp.pad(contrast_labels.astype(jnp.int32), (0, n_pad - n_cols),
                    constant_values=-1).reshape(1, n_pad)

    grid = (m_pad // tm, n_pad // tk)

    kernel = functools.partial(
        _supcon_kernel,
        inv_temperature=float(1.0 / temperature),
        loss_scale=float(temperature / base_temperature),
        n_valid_cols=int(n_cols),
        block_m=int(tm),
        block_k=int(tk),
    )

    cost = pl.CostEstimate(
        flops=2 * m_pad * n_pad * d_pad + 8 * m_pad * n_pad,
        transcendentals=m_pad * n_pad,
        bytes_accessed=(m_pad * d_pad * itemsize
                        + grid[0] * n_pad * d_pad * itemsize
                        + (m_pad + n_pad) * 4 + m_pad * 4),
    )

    per_anchor = pl.pallas_call(
        kernel,
        out_shape=jax.ShapeDtypeStruct((m_pad, 1), jnp.float32),
        grid_spec=pltpu.PrefetchScalarGridSpec(
            num_scalar_prefetch=0,
            grid=grid,
            in_specs=[
                pl.BlockSpec((tm, 1), lambda i, j: (i, 0)),        # anchor labels
                pl.BlockSpec((1, tk), lambda i, j: (0, j)),        # contrast labels
                pl.BlockSpec((tm, d_pad), lambda i, j: (i, 0)),    # anchor features
                pl.BlockSpec((tk, d_pad), lambda i, j: (j, 0)),    # contrast features
            ],
            out_specs=pl.BlockSpec((tm, 1), lambda i, j: (i, 0)),
            scratch_shapes=[pltpu.VMEM((tm, 1), jnp.float32)] * 5,
        ),
        compiler_params=pltpu.CompilerParams(
            dimension_semantics=("parallel", "arbitrary"),
            vmem_limit_bytes=32 * 1024 * 1024,
        ),
        cost_estimate=cost,
    )(a_lab, c_lab, a_feat, c_feat)

    # loss.view(anchor_count, batch_size).mean() == mean over all valid anchors.
    return jnp.mean(per_anchor[:m_rows, 0])


def _supcon_ref(features, labels=None, temperature=0.07, contrast_mode="all",
                base_temperature=0.07):
    """Pure-JAX reference mirroring the PyTorch module (high-precision matmul)."""
    bsz, n_views, dim = features.shape
    if labels is None:
        base_mask = jnp.eye(bsz, dtype=jnp.float32)
    else:
        labels = jnp.asarray(labels).reshape(-1, 1)
        base_mask = (labels == labels.T).astype(jnp.float32)
    cf = jnp.transpose(features, (1, 0, 2)).reshape(bsz * n_views, dim).astype(jnp.float32)
    if contrast_mode == "one":
        af = features[:, 0].astype(jnp.float32)
        anchor_count = 1
    else:
        af = cf
        anchor_count = n_views
    s = jnp.matmul(af, cf.T, precision=jax.lax.Precision.HIGHEST) / temperature
    logits = s - jnp.max(s, axis=1, keepdims=True)
    mask = jnp.tile(base_mask, (anchor_count, n_views))
    m_rows = anchor_count * bsz
    logits_mask = jnp.ones_like(mask).at[jnp.arange(m_rows), jnp.arange(m_rows)].set(0.0)
    mask = mask * logits_mask
    exp_logits = jnp.exp(logits) * logits_mask
    log_prob = logits - jnp.log(jnp.sum(exp_logits, axis=1, keepdims=True))
    mlpp = jnp.sum(mask * log_prob, axis=1) / jnp.sum(mask, axis=1)
    return jnp.mean(-(temperature / base_temperature) * mlpp)


if __name__ == "__main__":
    key = jax.random.PRNGKey(0)
    bsz, n_views, dim = 8, 2, 32
    feats = jax.random.normal(key, (bsz, n_views, dim), dtype=jnp.float32)
    feats = feats / jnp.linalg.norm(feats, axis=-1, keepdims=True)

    # 1) Exact path: f32 MXU operands, default SimCLR-style mask (labels=None).
    loss_f32 = jax.block_until_ready(supcon_loss(feats, matmul_dtype=jnp.float32))
    ref = _supcon_ref(feats)
    assert jnp.allclose(loss_f32, ref, rtol=1e-3, atol=1e-3), (loss_f32, ref)

    # 2) Supervised path with repeated labels, f32.
    labels = jnp.array([0, 1, 2, 3, 0, 1, 2, 3], dtype=jnp.int32)
    loss_lab = jax.block_until_ready(
        supcon_loss(feats, labels=labels, matmul_dtype=jnp.float32))
    ref_lab = _supcon_ref(feats, labels=labels)
    assert jnp.allclose(loss_lab, ref_lab, rtol=1e-3, atol=1e-3), (loss_lab, ref_lab)

    # 3) contrast_mode='one', f32.
    loss_one = jax.block_until_ready(
        supcon_loss(feats, labels=labels, contrast_mode="one", matmul_dtype=jnp.float32))
    ref_one = _supcon_ref(feats, labels=labels, contrast_mode="one")
    assert jnp.allclose(loss_one, ref_one, rtol=1e-3, atol=1e-3), (loss_one, ref_one)

    # 4) Default fast path: bf16 MXU operands (v6e/v7x recommendation), loose tol
    #    because T=0.07 amplifies bf16 Gram error ~14x.
    loss_bf16 = jax.block_until_ready(supcon_loss(feats))
    assert jnp.allclose(loss_bf16, ref, rtol=5e-2, atol=5e-2), (loss_bf16, ref)

    print("KERNEL_OK")
</pallas_src>

<mosaic_0001>
module attributes {stable_mosaic.version = 11 : i64} {
  func.func @_supcon_kernel(%arg0: i32, %arg1: i32, %arg2: memref<128x1xi32, #tpu.memory_space<vmem>>, %arg3: memref<1x128xi32, #tpu.memory_space<vmem>>, %arg4: memref<128x128xf32, #tpu.memory_space<vmem>>, %arg5: memref<128x128xf32, #tpu.memory_space<vmem>>, %arg6: memref<128x1xf32, #tpu.memory_space<vmem>>, %arg7: memref<128x1xf32, #tpu.memory_space<vmem>>, %arg8: memref<128x1xf32, #tpu.memory_space<vmem>>, %arg9: memref<128x1xf32, #tpu.memory_space<vmem>>, %arg10: memref<128x1xf32, #tpu.memory_space<vmem>>, %arg11: memref<128x1xf32, #tpu.memory_space<vmem>>) attributes {dimension_semantics = [#tpu.dimension_semantics<parallel>, #tpu.dimension_semantics<arbitrary>], iteration_bounds = array<i64: 1, 1>, scalar_prefetch = 0 : i64, scratch_operands = 5 : i64, tpu.core_type = #tpu.core_type<tc>, window_params = [{transform_indices = @transform_0, window_bounds = array<i64: 128, 1>}, {transform_indices = @transform_1, window_bounds = array<i64: 1, 128>}, {transform_indices = @transform_2, window_bounds = array<i64: 128, 128>}, {transform_indices = @transform_3, window_bounds = array<i64: 128, 128>}, {transform_indices = @transform_4, window_bounds = array<i64: 128, 1>}]} {
    %c0_i32 = arith.constant 0 : i32
    %0 = arith.cmpi eq, %arg1, %c0_i32 : i32
    %1 = arith.extui %0 : i1 to i32
    %c0_i32_0 = arith.constant 0 : i32
    %2 = arith.cmpi ne, %1, %c0_i32_0 : i32
    scf.if %2 {
      %cst_40 = arith.constant 0xFF800000 : f32
      %59 = vector.broadcast %cst_40 : f32 to vector<128x1xf32>
      %c0_41 = arith.constant 0 : index
      %c0_42 = arith.constant 0 : index
      %60 = vector.load %arg7[%c0_41, %c0_42] : memref<128x1xf32, #tpu.memory_space<vmem>>, vector<128x1xf32>
      tpu.vector_store %arg7[%c0_41, %c0_42], %59 {strides = array<i32>} : memref<128x1xf32, #tpu.memory_space<vmem>>, vector<128x1xf32>,
      %cst_43 = arith.constant 0.000000e+00 : f32
      %61 = vector.broadcast %cst_43 : f32 to vector<128x1xf32>
      %c0_44 = arith.constant 0 : index
      %c0_45 = arith.constant 0 : index
      %62 = vector.load %arg8[%c0_44, %c0_45] : memref<128x1xf32, #tpu.memory_space<vmem>>, vector<128x1xf32>
      tpu.vector_store %arg8[%c0_44, %c0_45], %61 {strides = array<i32>} : memref<128x1xf32, #tpu.memory_space<vmem>>, vector<128x1xf32>,
      %cst_46 = arith.constant 0.000000e+00 : f32
      %63 = vector.broadcast %cst_46 : f32 to vector<128x1xf32>
      %c0_47 = arith.constant 0 : index
      %c0_48 = arith.constant 0 : index
      %64 = vector.load %arg9[%c0_47, %c0_48] : memref<128x1xf32, #tpu.memory_space<vmem>>, vector<128x1xf32>
      tpu.vector_store %arg9[%c0_47, %c0_48], %63 {strides = array<i32>} : memref<128x1xf32, #tpu.memory_space<vmem>>, vector<128x1xf32>,
      %cst_49 = arith.constant 0.000000e+00 : f32
      %65 = vector.broadcast %cst_49 : f32 to vector<128x1xf32>
      %c0_50 = arith.constant 0 : index
      %c0_51 = arith.constant 0 : index
      %66 = vector.load %arg10[%c0_50, %c0_51] : memref<128x1xf32, #tpu.memory_space<vmem>>, vector<128x1xf32>
      tpu.vector_store %arg10[%c0_50, %c0_51], %65 {strides = array<i32>} : memref<128x1xf32, #tpu.memory_space<vmem>>, vector<128x1xf32>,
    } else {
    }
    %c0 = arith.constant 0 : index
    %c0_1 = arith.constant 0 : index
    %3 = vector.load %arg4[%c0, %c0_1] : memref<128x128xf32, #tpu.memory_space<vmem>>, vector<128x128xf32>
    %cst = arith.constant 14.2857141 : f32
    %4 = vector.broadcast %cst : f32 to vector<128x128xf32>
    %5 = arith.mulf %3, %4 : vector<128x128xf32>
    %c0_2 = arith.constant 0 : index
    %c0_3 = arith.constant 0 : index
    %6 = vector.load %arg5[%c0_2, %c0_3] : memref<128x128xf32, #tpu.memory_space<vmem>>, vector<128x128xf32>
    %cst_4 = arith.constant dense<0.000000e+00> : vector<128x128xf32>
    %7 = tpu.matmul %5, %6, %cst_4 {dimension_numbers = #tpu.dot_dimension_numbers<[1], [1], [0], [0], [0, 0, 1, 0], [], []>} : vector<128x128xf32>, vector<128x128xf32>, vector<128x128xf32> -> vector<128x128xf32>
    %c0_5 = arith.constant 0 : index
    %c0_6 = arith.constant 0 : index
    %8 = vector.load %arg7[%c0_5, %c0_6] : memref<128x1xf32, #tpu.memory_space<vmem>>, vector<128x1xf32>
    %cst_7 = arith.constant dense<0xFF800000> : vector<128xf32>
    %9 = vector.multi_reduction <maximumf>, %7, %cst_7 [1] : vector<128x128xf32> to vector<128xf32>
    %10 = vector.shape_cast %9 : vector<128xf32> to vector<128x1xf32>
    %11 = arith.maximumf %8, %10 : vector<128x1xf32>
    %12 = arith.subf %8, %11 : vector<128x1xf32>
    %13 = math.exp %12 : vector<128x1xf32>
    %14 = vector.broadcast %11 : vector<128x1xf32> to vector<128x128xf32>
    %15 = arith.subf %7, %14 : vector<128x128xf32>
    %16 = math.exp %15 : vector<128x128xf32>
    %c0_8 = arith.constant 0 : index
    %c0_9 = arith.constant 0 : index
    %17 = vector.load %arg2[%c0_8, %c0_9] : memref<128x1xi32, #tpu.memory_space<vmem>>, vector<128x1xi32>
    %c0_10 = arith.constant 0 : index
    %c0_11 = arith.constant 0 : index
    %18 = vector.load %arg3[%c0_10, %c0_11] : memref<1x128xi32, #tpu.memory_space<vmem>>, vector<1x128xi32>
    %19 = vector.broadcast %17 : vector<128x1xi32> to vector<128x128xi32>
    %20 = vector.broadcast %18 : vector<1x128xi32> to vector<128x128xi32>
    %21 = arith.cmpi eq, %19, %20 : vector<128x128xi32>
    %22 = arith.extui %21 : vector<128x128xi1> to vector<128x128xi32>
    %23 = arith.sitofp %22 : vector<128x128xi32> to vector<128x128xf32>
    %cst_12 = arith.constant dense<0.000000e+00> : vector<128xf32>
    %24 = vector.multi_reduction <add>, %16, %cst_12 [1] : vector<128x128xf32> to vector<128xf32>
    %25 = vector.shape_cast %24 : vector<128xf32> to vector<128x1xf32>
    %c0_13 = arith.constant 0 : index
    %c0_14 = arith.constant 0 : index
    %26 = vector.load %arg11[%c0_13, %c0_14] : memref<128x1xf32, #tpu.memory_space<vmem>>, vector<128x1xf32>
    tpu.vector_store %arg11[%c0_13, %c0_14], %25 {strides = array<i32>} : memref<128x1xf32, #tpu.memory_space<vmem>>, vector<128x1xf32>,
    %c0_15 = arith.constant 0 : index
    %c0_16 = arith.constant 0 : index
    %27 = vector.load %arg9[%c0_15, %c0_16] : memref<128x1xf32, #tpu.memory_space<vmem>>, vector<128x1xf32>
    %28 = arith.mulf %23, %7 : vector<128x128xf32>
    %cst_17 = arith.constant dense<0.000000e+00> : vector<128xf32>
    %29 = vector.multi_reduction <add>, %28, %cst_17 [1] : vector<128x128xf32> to vector<128xf32>
    %30 = vector.shape_cast %29 : vector<128xf32> to vector<128x1xf32>
    %31 = arith.addf %27, %30 : vector<128x1xf32>
    %c0_18 = arith.constant 0 : index
    %c0_19 = arith.constant 0 : index
    %32 = vector.load %arg9[%c0_18, %c0_19] : memref<128x1xf32, #tpu.memory_space<vmem>>, vector<128x1xf32>
    tpu.vector_store %arg9[%c0_18, %c0_19], %31 {strides = array<i32>} : memref<128x1xf32, #tpu.memory_space<vmem>>, vector<128x1xf32>,
    %c0_20 = arith.constant 0 : index
    %c0_21 = arith.constant 0 : index
    %33 = vector.load %arg10[%c0_20, %c0_21] : memref<128x1xf32, #tpu.memory_space<vmem>>, vector<128x1xf32>
    %cst_22 = arith.constant dense<0.000000e+00> : vector<128xf32>
    %34 = vector.multi_reduction <add>, %23, %cst_22 [1] : vector<128x128xf32> to vector<128xf32>
    %35 = vector.shape_cast %34 : vector<128xf32> to vector<128x1xf32>
    %36 = arith.addf %33, %35 : vector<128x1xf32>
    %c0_23 = arith.constant 0 : index
    %c0_24 = arith.constant 0 : index
    %37 = vector.load %arg10[%c0_23, %c0_24] : memref<128x1xf32, #tpu.memory_space<vmem>>, vector<128x1xf32>
    tpu.vector_store %arg10[%c0_23, %c0_24], %36 {strides = array<i32>} : memref<128x1xf32, #tpu.memory_space<vmem>>, vector<128x1xf32>,
    %c128_i32 = arith.constant 128 : i32
    %38 = arith.muli %arg0, %c128_i32 : i32
    %c128_i32_25 = arith.constant 128 : i32
    %39 = arith.muli %arg1, %c128_i32_25 : i32
    %c128_i32_26 = arith.constant 128 : i32
    %40 = arith.addi %39, %c128_i32_26 : i32
    %41 = arith.cmpi slt, %38, %40 : i32
    %c128_i32_27 = arith.constant 128 : i32
    %42 = arith.addi %38, %c128_i32_27 : i32
    %43 = arith.cmpi slt, %39, %42 : i32
    %44 = arith.andi %41, %43 : i1
    %c128_i32_28 = arith.constant 128 : i32
    %45 = arith.addi %39, %c128_i32_28 : i32
    %c16_i32 = arith.constant 16 : i32
    %46 = arith.cmpi sgt, %45, %c16_i32 : i32
    %47 = arith.ori %44, %46 : i1
    %48 = arith.extui %47 : i1 to i32
    %c0_i32_29 = arith.constant 0 : i32
    %49 = arith.cmpi ne, %48, %c0_i32_29 : i32
    scf.if %49 {
      %59 = tpu.iota {dimensions = array<i32: 0>} : vector<128x128xi32>
      %60 = vector.broadcast %38 : i32 to vector<128x128xi32>
      %61 = arith.addi %60, %59 : vector<128x128xi32>
      %62 = tpu.iota {dimensions = array<i32: 1>} : vector<128x128xi32>
      %63 = vector.broadcast %39 : i32 to vector<128x128xi32>
      %64 = arith.addi %63, %62 : vector<128x128xi32>
      %65 = arith.cmpi ne, %61, %64 : vector<128x128xi32>
      %c16_i32_40 = arith.constant 16 : i32
      %66 = vector.broadcast %c16_i32_40 : i32 to vector<128x128xi32>
      %67 = arith.cmpi slt, %64, %66 : vector<128x128xi32>
      %68 = arith.andi %65, %67 : vector<128x128xi1>
      %69 = arith.extui %68 : vector<128x128xi1> to vector<128x128xi32>
      %70 = arith.sitofp %69 : vector<128x128xi32> to vector<128x128xf32>
      %71 = arith.mulf %16, %70 : vector<128x128xf32>
      %cst_41 = arith.constant dense<0.000000e+00> : vector<128xf32>
      %72 = vector.multi_reduction <add>, %71, %cst_41 [1] : vector<128x128xf32> to vector<128xf32>
      %73 = vector.shape_cast %72 : vector<128xf32> to vector<128x1xf32>
      %c0_42 = arith.constant 0 : index
      %c0_43 = arith.constant 0 : index
      %74 = vector.load %arg11[%c0_42, %c0_43] : memref<128x1xf32, #tpu.memory_space<vmem>>, vector<128x1xf32>
      tpu.vector_store %arg11[%c0_42, %c0_43], %73 {strides = array<i32>} : memref<128x1xf32, #tpu.memory_space<vmem>>, vector<128x1xf32>,
      %cst_44 = arith.constant 1.000000e+00 : f32
      %75 = vector.broadcast %cst_44 : f32 to vector<128x128xf32>
      %76 = arith.subf %75, %70 : vector<128x128xf32>
      %77 = arith.mulf %23, %76 : vector<128x128xf32>
      %c0_45 = arith.constant 0 : index
      %c0_46 = arith.constant 0 : index
      %78 = vector.load %arg9[%c0_45, %c0_46] : memref<128x1xf32, #tpu.memory_space<vmem>>, vector<128x1xf32>
      %79 = arith.mulf %77, %7 : vector<128x128xf32>
      %cst_47 = arith.constant dense<0.000000e+00> : vector<128xf32>
      %80 = vector.multi_reduction <add>, %79, %cst_47 [1] : vector<128x128xf32> to vector<128xf32>
      %81 = vector.shape_cast %80 : vector<128xf32> to vector<128x1xf32>
      %82 = arith.subf %78, %81 : vector<128x1xf32>
      %c0_48 = arith.constant 0 : index
      %c0_49 = arith.constant 0 : index
      %83 = vector.load %arg9[%c0_48, %c0_49] : memref<128x1xf32, #tpu.memory_space<vmem>>, vector<128x1xf32>
      tpu.vector_store %arg9[%c0_48, %c0_49], %82 {strides = array<i32>} : memref<128x1xf32, #tpu.memory_space<vmem>>, vector<128x1xf32>,
      %c0_50 = arith.constant 0 : index
      %c0_51 = arith.constant 0 : index
      %84 = vector.load %arg10[%c0_50, %c0_51] : memref<128x1xf32, #tpu.memory_space<vmem>>, vector<128x1xf32>
      %cst_52 = arith.constant dense<0.000000e+00> : vector<128xf32>
      %85 = vector.multi_reduction <add>, %77, %cst_52 [1] : vector<128x128xf32> to vector<128xf32>
      %86 = vector.shape_cast %85 : vector<128xf32> to vector<128x1xf32>
      %87 = arith.subf %84, %86 : vector<128x1xf32>
      %c0_53 = arith.constant 0 : index
      %c0_54 = arith.constant 0 : index
      %88 = vector.load %arg10[%c0_53, %c0_54] : memref<128x1xf32, #tpu.memory_space<vmem>>, vector<128x1xf32>
      tpu.vector_store %arg10[%c0_53, %c0_54], %87 {strides = array<i32>} : memref<128x1xf32, #tpu.memory_space<vmem>>, vector<128x1xf32>,
    } else {
    }
    %c0_30 = arith.constant 0 : index
    %c0_31 = arith.constant 0 : index
    %50 = vector.load %arg8[%c0_30, %c0_31] : memref<128x1xf32, #tpu.memory_space<vmem>>, vector<128x1xf32>
    %51 = arith.mulf %13, %50 : vector<128x1xf32>
    %c0_32 = arith.constant 0 : index
    %c0_33 = arith.constant 0 : index
    %52 = vector.load %arg11[%c0_32, %c0_33] : memref<128x1xf32, #tpu.memory_space<vmem>>, vector<128x1xf32>
    %53 = arith.addf %51, %52 : vector<128x1xf32>
    %c0_34 = arith.constant 0 : index
    %c0_35 = arith.constant 0 : index
    %54 = vector.load %arg8[%c0_34, %c0_35] : memref<128x1xf32, #tpu.memory_space<vmem>>, vector<128x1xf32>
    tpu.vector_store %arg8[%c0_34, %c0_35], %53 {strides = array<i32>} : memref<128x1xf32, #tpu.memory_space<vmem>>, vector<128x1xf32>,
    %c0_36 = arith.constant 0 : index
    %c0_37 = arith.constant 0 : index
    %55 = vector.load %arg7[%c0_36, %c0_37] : memref<128x1xf32, #tpu.memory_space<vmem>>, vector<128x1xf32>
    tpu.vector_store %arg7[%c0_36, %c0_37], %11 {strides = array<i32>} : memref<128x1xf32, #tpu.memory_space<vmem>>, vector<128x1xf32>,
    %c0_i32_38 = arith.constant 0 : i32
    %56 = arith.cmpi eq, %arg1, %c0_i32_38 : i32
    %57 = arith.extui %56 : i1 to i32
    %c0_i32_39 = arith.constant 0 : i32
    %58 = arith.cmpi ne, %57, %c0_i32_39 : i32
    scf.if %58 {
      %c0_40 = arith.constant 0 : index
      %c0_41 = arith.constant 0 : index
      %59 = vector.load %arg10[%c0_40, %c0_41] : memref<128x1xf32, #tpu.memory_space<vmem>>, vector<128x1xf32>
      %cst_42 = arith.constant 0.000000e+00 : f32
      %60 = vector.broadcast %cst_42 : f32 to vector<128x1xf32>
      %61 = arith.cmpf ogt, %59, %60 : vector<128x1xf32>
      %cst_43 = arith.constant 1.000000e+00 : f32
      %62 = vector.broadcast %cst_43 : f32 to vector<128x1xf32>
      %63 = arith.select %61, %59, %62 : vector<128x1xi1>, vector<128x1xf32>
      %c0_44 = arith.constant 0 : index
      %c0_45 = arith.constant 0 : index
      %64 = vector.load %arg9[%c0_44, %c0_45] : memref<128x1xf32, #tpu.memory_space<vmem>>, vector<128x1xf32>
      %65 = arith.divf %64, %63 : vector<128x1xf32>
      %c0_46 = arith.constant 0 : index
      %c0_47 = arith.constant 0 : index
      %66 = vector.load %arg7[%c0_46, %c0_47] : memref<128x1xf32, #tpu.memory_space<vmem>>, vector<128x1xf32>
      %67 = arith.subf %65, %66 : vector<128x1xf32>
      %c0_48 = arith.constant 0 : index
      %c0_49 = arith.constant 0 : index
      %68 = vector.load %arg8[%c0_48, %c0_49] : memref<128x1xf32, #tpu.memory_space<vmem>>, vector<128x1xf32>
      %69 = math.log %68 : vector<128x1xf32>
      %70 = arith.subf %67, %69 : vector<128x1xf32>
      %cst_50 = arith.constant -1.000000e+00 : f32
      %71 = vector.broadcast %cst_50 : f32 to vector<128x1xf32>
      %72 = arith.mulf %71, %70 : vector<128x1xf32>
      %cst_51 = arith.constant 0.000000e+00 : f32
      %73 = vector.broadcast %cst_51 : f32 to vector<128x1xf32>
      %74 = arith.cmpf ogt, %59, %73 : vector<128x1xf32>
      %cst_52 = arith.constant 0.000000e+00 : f32
      %75 = vector.broadcast %cst_52 : f32 to vector<128x1xf32>
      %76 = arith.select %74, %72, %75 : vector<128x1xi1>, vector<128x1xf32>
      %c0_53 = arith.constant 0 : index
      %c0_54 = arith.constant 0 : index
      %77 = vector.load %arg6[%c0_53, %c0_54] : memref<128x1xf32, #tpu.memory_space<vmem>>, vector<128x1xf32>
      tpu.vector_store %arg6[%c0_53, %c0_54], %76 {strides = array<i32>} : memref<128x1xf32, #tpu.memory_space<vmem>>, vector<128x1xf32>,
    } else {
    }
    return
  }
  func.func @transform_0(%arg0: i32, %arg1: i32) -> (i32, i32) {
    %c0_i32 = arith.constant 0 : i32
    %c0_i32_0 = arith.constant 0 : i32
    return %arg0, %c0_i32 : i32, i32
  }
  func.func @transform_1(%arg0: i32, %arg1: i32) -> (i32, i32) {
    %c0_i32 = arith.constant 0 : i32
    %c0_i32_0 = arith.constant 0 : i32
    return %c0_i32, %arg1 : i32, i32
  }
  func.func @transform_2(%arg0: i32, %arg1: i32) -> (i32, i32) {
    %c0_i32 = arith.constant 0 : i32
    %c0_i32_0 = arith.constant 0 : i32
    return %arg0, %c0_i32 : i32, i32
  }
  func.func @transform_3(%arg0: i32, %arg1: i32) -> (i32, i32) {
    %c0_i32 = arith.constant 0 : i32
    %c0_i32_0 = arith.constant 0 : i32
    return %arg1, %c0_i32 : i32, i32
  }
  func.func @transform_4(%arg0: i32, %arg1: i32) -> (i32, i32) {
    %c0_i32 = arith.constant 0 : i32
    %c0_i32_0 = arith.constant 0 : i32
    return %arg0, %c0_i32 : i32, i32
  }
}

</mosaic_0001>

<bundles_post_ra>
// kernel: tpu_custom_call.1
= control target key start
LH: loop header
LB: loop body
LE: loop exit
PB: predicated region body
PF: predicated region fallthrough
CT: control target
= control target key end

     0   :  { %9 = vsyncpa [#allocation8], 0  ;;  %s1936_s15 = smov [#allocation7]   ;;  %s3173_s0 = inlined_call_operand.vmem [shape: s32[128,1], index: 0, kind: input, shape index: {}]   ;;  %s3174_s1 = inlined_call_operand.vmem [shape: s32[1,128], index: 1, kind: input, shape index: {}]   ;;  %s3175_s2 = inlined_call_operand.vmem [shape: f32[128,128], index: 2, kind: input, shape index: {}]   ;;  %s3176_s3 = inlined_call_operand.hbm [shape: f32[128,128], index: 3, kind: input, shape index: {}]   ;;  %s3177_s4 = inlined_call_operand.vmem [shape: f32[128,1], index: 4, kind: output, shape index: {}]  }
   0x1   :  { %s21_s16 = sshll.u32 %s1936_s15, 4  ;;  %s1912_s19 = scalar_lea.hbm %s3176_s3, 2048  ;;  %s22_s16 = int_to_ptr.vmem [resolvable:$true] %s21_s16 }
   0x2   :  { %p1913_p0 = scmp.ne.s32.totalorder %s3176_s3, %s1912_s19  ;;  %p1916_p1 = scmp.lt.u32.totalorder %s1912_s19, %s3176_s3 }
   0x4   :  { %p1918_p2 = pnand %p1916_p1, %p1913_p0 }
   0x6   :  { %1921 = shalt.err (!%p1918_p2)
}
   0x7   :  { %s1922_s24 = scalar_lea.vmem %s22_s16, 2048  ;;  %p1927_p4 = scmp.lt.s32.totalorder %s22_s16, %s22_s16 }
   0x8   :  { %p1923_p3 = scmp.ne.s32.totalorder %s22_s16, %s1922_s24  ;;  %p1928_p5 = scmp.lt.s32.totalorder %s1922_s24, %s1922_s24 }
   0xa   :  { %p1929_p6 = por %p1928_p5, %p1927_p4 }
   0xc   :  { %p1930_p7 = pnand %p1929_p6, %p1923_p3 }
   0xe   :  { %1933 = shalt.err (!%p1930_p7)
}
   0xf   :  { %s1937_s25 = smov 128   ;;  %s1938_s26 = smov 8  }
  0x10   :  { %27 = dma.hbm_to_vmem [thread:$0]  %s3176_s3, 2048, %s22_s16, [#allocation8], %s1937_s25, %s1937_s25, %s1938_s26  }
  0x11   :  { %1934 = dma.done.wait [#allocation8], 2048  }
  0x12   :  { %1935 = vsyncadd [#allocation8], 4294965248  ;;  %v1939_v0 = vmov 0   ;;  %v132_v1 = vld [vmem:[#allocation7] sm:$0xff]  ;;  %v133_v2 = vld [vmem:[#allocation7 + $0x8] sm:$0xff] }
  0x13   :  { %1783 = vset.pattern.permute.xlu0 %v1939_v0  ;;  %1782 = vset.pattern.permute.xlu1 %v1939_v0  ;;  %v134_v3 = vld [vmem:[#allocation7 + $0x10] sm:$0xff]  ;;  %v1728_v4 = vpack.c.bf16 %v133_v2, %v132_v1  ;;  %v135_v5 = vld [vmem:[#allocation7 + $0x18] sm:$0xff]  ;;  %v534_v7 = vld [vmem:[%s3173_s0 + $0x8] sm:$0xff] }
  0x14   :  { %v1732_v6 = vpack.c.bf16 %v135_v5, %v134_v3  ;;  %v533_v8 = vld [vmem:[%s3173_s0] sm:$0xff]  ;;  %v137_v10 = vld [vmem:[#allocation7 + $0x28] sm:$0xff]  ;;  %554 = vperm.xlu0 %1783, %v534_v7   ;;  %v536_v11 = vld [vmem:[%s3173_s0 + $0x18] sm:$0xff] }
  0x15   :  { %1729 = vmatprep.subr.bf16.mxu0 %v1728_v4  ;;  %1760 = vmatprep.subr.bf16.mxu1 %v1728_v4  ;;  %v136_v9 = vld [vmem:[#allocation7 + $0x20] sm:$0xff]  ;;  %v535_v12 = vld [vmem:[%s3173_s0 + $0x10] sm:$0xff]  ;;  %v538_v15 = vld [vmem:[%s3173_s0 + $0x28] sm:$0xff] }
  0x16   :  { %1731 = vmatpush3.bf16.xpose.msra.mxu0 %v1728_v4  ;;  %1768 = vmatpush3.bf16.xpose.msra.mxu1 %v1728_v4  ;;  %v1736_v13 = vpack.c.bf16 %v137_v10, %v136_v9  ;;  %v100_v14 = vld [vmem:[%s3175_s2] sm:$0xff]  ;;  %v138_v20 = vld [vmem:[#allocation7 + $0x30] sm:$0xff]  ;;  %v139_v21 = vld [vmem:[#allocation7 + $0x38] sm:$0xff] }
  0x17   :  { %1733 = vmatprep.subr.bf16.mxu0 %v1732_v6  ;;  %1761 = vmatprep.subr.bf16.mxu1 %v1732_v6  ;;  %v537_v16 = vld [vmem:[%s3173_s0 + $0x20] sm:$0xff]  ;;  %v116_v17 = vmul.f32 14.285714, %v100_v14  ;;  %v540_v22 = vld [vmem:[%s3173_s0 + $0x38] sm:$0xff]  ;;  %v539_v23 = vld [vmem:[%s3173_s0 + $0x30] sm:$0xff]  ;;  %v1740_v24 = vpack.c.bf16 %v139_v21, %v138_v20 }
  0x18   :  { %551 = vperm.xlu1 %1782, %v533_v8   ;;  %560 = vperm.xlu0 %1783, %v536_v11   ;;  %v108_v18 = vld [vmem:[%s3175_s2 + $0x40] sm:$0xff]  ;;  %v542_v25 = vld [vmem:[%s3173_s0 + $0x48] sm:$0xff]  ;;  %v544_v29 = vld [vmem:[%s3173_s0 + $0x58] sm:$0xff] }
  0x19   :  { %v124_v19 = vmul.f32 14.285714, %v108_v18  ;;  %1704 = vmatprep.mubr.f32.mxu0 %v116_v17  ;;  %v541_v26 = vld [vmem:[%s3173_s0 + $0x40] sm:$0xff]  ;;  %v141_v28 = vld [vmem:[#allocation7 + $0x48] sm:$0xff]  ;;  %v543_v30 = vld [vmem:[%s3173_s0 + $0x50] sm:$0xff] }
  0x1a   :  { %v140_v27 = vld [vmem:[#allocation7 + $0x40] sm:$0xff]  ;;  %v546_v32 = vld [vmem:[%s3173_s0 + $0x68] sm:$0xff]  ;;  %v142_v34 = vld [vmem:[#allocation7 + $0x50] sm:$0xff] }
  0x1b   :  { %1716 = vmatprep.mubr.f32.mxu1 %v124_v19  ;;  %v1744_v31 = vpack.c.bf16 %v141_v28, %v140_v27  ;;  %v545_v33 = vld [vmem:[%s3173_s0 + $0x60] sm:$0xff]  ;;  %v143_v35 = vld [vmem:[#allocation7 + $0x58] sm:$0xff]  ;;  %v547_v37 = vld [vmem:[%s3173_s0 + $0x70] sm:$0xff]  ;;  %v888_v19 = vlaneseq }
  0x1c   :  { %557 = vperm.xlu1 %1782, %v535_v12   ;;  %566 = vperm.xlu0 %1783, %v538_v15   ;;  %v548_v36 = vld [vmem:[%s3173_s0 + $0x78] sm:$0xff]  ;;  %v1748_v38 = vpack.c.bf16 %v143_v35, %v142_v34  ;;  %v144_v39 = vld [vmem:[#allocation7 + $0x60] sm:$0xff]  ;;  %v145_v40 = vld [vmem:[#allocation7 + $0x68] sm:$0xff]  ;;  %v1940_v12 = vmov 0.0  }
  0x1d   :  { %v1752_v41 = vpack.c.bf16 %v145_v40, %v144_v39  ;;  %v146_v42 = vld [vmem:[#allocation7 + $0x70] sm:$0xff]  ;;  %v147_v43 = vld [vmem:[#allocation7 + $0x78] sm:$0xff]  ;;  %v101_v45 = vld [vmem:[%s3175_s2 + $0x8] sm:$0xff]  ;;  %v2112_v27 = vand.u32 127, %v888_v19 }
  0x1e   :  { %1735 = vmatpush3.bf16.xpose.msra.mxu0 %v1732_v6  ;;  %1769 = vmatpush3.bf16.xpose.msra.mxu1 %v1732_v6  ;;  %v1756_v44 = vpack.c.bf16 %v147_v43, %v146_v42  ;;  %v109_v46 = vld [vmem:[%s3175_s2 + $0x48] sm:$0xff]  ;;  %v102_v47 = vld [vmem:[%s3175_s2 + $0x10] sm:$0xff]  ;;  %v117_v49 = vmul.f32 14.285714, %v101_v45  ;;  %v103_v53 = vld [vmem:[%s3175_s2 + $0x18] sm:$0xff] }
  0x1f   :  { %1737 = vmatprep.subr.bf16.mxu0 %v1736_v13  ;;  %1762 = vmatprep.subr.bf16.mxu1 %v1736_v13  ;;  %v110_v48 = vld [vmem:[%s3175_s2 + $0x50] sm:$0xff]  ;;  %v125_v50 = vmul.f32 14.285714, %v109_v46  ;;  %v118_v51 = vmul.f32 14.285714, %v102_v47  ;;  %v111_v54 = vld [vmem:[%s3175_s2 + $0x58] sm:$0xff] }
  0x20   :  { %563 = vperm.xlu1 %1782, %v537_v16   ;;  %572 = vperm.xlu0 %1783, %v540_v22   ;;  %v126_v52 = vmul.f32 14.285714, %v110_v48  ;;  %v104_v55 = vld [vmem:[%s3175_s2 + $0x20] sm:$0xff]  ;;  %v119_v57 = vmul.f32 14.285714, %v103_v53  ;;  %v105_v61 = vld [vmem:[%s3175_s2 + $0x28] sm:$0xff] }
  0x21   :  { %v112_v56 = vld [vmem:[%s3175_s2 + $0x60] sm:$0xff]  ;;  %v127_v58 = vmul.f32 14.285714, %v111_v54  ;;  %v120_v59 = vmul.f32 14.285714, %v104_v55  ;;  %v113_v62 = vld [vmem:[%s3175_s2 + $0x68] sm:$0xff] }
  0x22   :  { %v128_v60 = vmul.f32 14.285714, %v112_v56  ;;  %v106_v63 = vld [vmem:[%s3175_s2 + $0x30] sm:$0xff]  ;;  %v121_v1 = vmul.f32 14.285714, %v105_v61  ;;  %v107_v5 = vld [vmem:[%s3175_s2 + $0x38] sm:$0xff] }
  0x23   :  { %v114_v0 = vld [vmem:[%s3175_s2 + $0x70] sm:$0xff]  ;;  %v129_v2 = vmul.f32 14.285714, %v113_v62  ;;  %v122_v3 = vmul.f32 14.285714, %v106_v63  ;;  %v115_v6 = vld [vmem:[%s3175_s2 + $0x78] sm:$0xff] }
  0x24   :  { %569 = vperm.xlu1 %1782, %v539_v23   ;;  %578 = vperm.xlu0 %1783, %v542_v25   ;;  %v130_v4 = vmul.f32 14.285714, %v114_v0  ;;  %v123_v7 = vmul.f32 14.285714, %v107_v5  ;;  %v131_v8 = vmul.f32 14.285714, %v115_v6 }
  0x25   :  { %v2078_v9 = vld [vmem:[%s3174_s1] ss:$0 sm:$0xff]  ;;  %vm942_vm8 = vcmp.lt.s32.totalorder %v2112_v27, 16 }
  0x26   :  { %1739 = vmatpush3.bf16.xpose.msra.mxu0 %v1736_v13  ;;  %1770 = vmatpush3.bf16.xpose.msra.mxu1 %v1736_v13 }
  0x27   :  { %1741 = vmatprep.subr.bf16.mxu0 %v1740_v24  ;;  %1763 = vmatprep.subr.bf16.mxu1 %v1740_v24 }
  0x28   :  { %575 = vperm.xlu1 %1782, %v541_v26   ;;  %584 = vperm.xlu0 %1783, %v544_v29  }
  0x2c   :  { %581 = vperm.xlu1 %1782, %v543_v30   ;;  %590 = vperm.xlu0 %1783, %v546_v32  }
  0x2e   :  { %1743 = vmatpush3.bf16.xpose.msra.mxu0 %v1740_v24  ;;  %1771 = vmatpush3.bf16.xpose.msra.mxu1 %v1740_v24  ;;  %v2108_v24 = vshrl.u32 %v888_v19, 7 }
  0x2f   :  { %1745 = vmatprep.subr.bf16.mxu0 %v1744_v31  ;;  %1764 = vmatprep.subr.bf16.mxu1 %v1744_v31 }
  0x30   :  { %587 = vperm.xlu1 %1782, %v545_v33   ;;  %596 = vperm.xlu0 %1783, %v548_v36   ;;  %v890_v30 = vadd.s32 8, %v2108_v24  ;;  %vm926_vm11 = vcmp.ne.s32.totalorder %v2108_v24, %v2112_v27  ;;  %v892_v33 = vadd.s32 24, %v2108_v24  ;;  %v891_v36 = vadd.s32 16, %v2108_v24 }
  0x31   :  { %vm943_vm13 = vmand %vm926_vm11, %vm942_vm8  ;;  %v894_v39 = vadd.s32 40, %v2108_v24  ;;  %v893_v42 = vadd.s32 32, %v2108_v24  ;;  %v896_v48 = vadd.s32 56, %v2108_v24  ;;  %v2219_v62 = vadd.s32 64, %v2108_v24 }
  0x32   :  { %vm927_vm12 = vcmp.ne.s32.totalorder %v890_v30, %v2112_v27  ;;  %v2163_v46 = vsel %vm943_vm13, 1.0, %v1940_v12 }
  0x33   :  { %v1055_v53 = vsub.f32 1.0, %v2163_v46 }
  0x34   :  { %593 = vperm.xlu1 %1782, %v547_v37  }
  0x36   :  { %1747 = vmatpush3.bf16.xpose.msra.mxu0 %v1744_v31  ;;  %1772 = vmatpush3.bf16.xpose.msra.mxu1 %v1744_v31 }
  0x37   :  { %1749 = vmatprep.subr.bf16.mxu0 %v1748_v38  ;;  %1765 = vmatprep.subr.bf16.mxu1 %v1748_v38 }
  0x3e   :  { %1751 = vmatpush3.bf16.xpose.msra.mxu0 %v1748_v38  ;;  %1773 = vmatpush3.bf16.xpose.msra.mxu1 %v1748_v38 }
  0x3f   :  { %1753 = vmatprep.subr.bf16.mxu0 %v1752_v41  ;;  %1766 = vmatprep.subr.bf16.mxu1 %v1752_v41 }
  0x46   :  { %1755 = vmatpush3.bf16.xpose.msra.mxu0 %v1752_v41  ;;  %1774 = vmatpush3.bf16.xpose.msra.mxu1 %v1752_v41 }
  0x47   :  { %1757 = vmatprep.subr.bf16.mxu0 %v1756_v44  ;;  %1767 = vmatprep.subr.bf16.mxu1 %v1756_v44 }
  0x4e   :  { %1759 = vmatpush3.bf16.xpose.msra.mxu0 %v1756_v44  ;;  %1775 = vmatpush3.bf16.xpose.msra.mxu1 %v1756_v44 }
  0x55   :  { %1705 = vmatmul.mubr.f32.vlgmr.msra.gmra.mrb[0].mxu0 %v117_v49  ;;  %1717 = vmatmul.mubr.f32.vlgmr.msra.gmra.mrb[0].mxu1 %v125_v50 }
  0x56   :  { %1707 = vmatprep.mubr.f32.mxu0 %v118_v51  ;;  %1719 = vmatprep.mubr.f32.mxu1 %v126_v52  ;;  %v895_v51 = vadd.s32 48, %v2108_v24 }
  0x59   :  { %1708 = vmatmul.mubr.f32.gmra.mrb[2].mxu0 %v119_v57  ;;  %1720 = vmatmul.mubr.f32.gmra.mrb[2].mxu1 %v127_v58 }
  0x5a   :  { %1710 = vmatprep.mubr.f32.mxu0 %v120_v59  ;;  %1722 = vmatprep.mubr.f32.mxu1 %v128_v60  ;;  %v2209_v59 = vadd.s32 72, %v2108_v24 }
  0x5d   :  { %1711 = vmatmul.mubr.f32.gmra.mrb[4].mxu0 %v121_v1  ;;  %1723 = vmatmul.mubr.f32.gmra.mrb[4].mxu1 %v129_v2 }
  0x5e   :  { %1713 = vmatprep.mubr.f32.mxu0 %v122_v3  ;;  %1725 = vmatprep.mubr.f32.mxu1 %v130_v4 }
  0x61   :  { %1714 = vmatmul.mubr.f32.gmra.mrb[6].mxu0 %v123_v7  ;;  %1726 = vmatmul.mubr.f32.gmra.mrb[6].mxu1 %v131_v8  ;;  %v2254_v7 = vadd.s32 88, %v2108_v24  ;;  %v2259_v8 = vadd.s32 80, %v2108_v24 }
  0x93   :  { %v555_v10 = vpop.permute.xlu0 %554 }
  0x94   :  { %vm603_vm0 = vcmp.eq.s32.totalorder %v555_v10, %v2078_v9 }
  0x95   :  { %v2083_v13 = vsel %vm603_vm0, 1.0, %v1940_v12  ;;  %vm944_vm0 = vmand %vm927_vm12, %vm942_vm8 }
  0x96   :  { %813 = vadd.xlane.f32.xlu1 %v2083_v13  ;;  %v2160_v45 = vsel %vm944_vm0, 1.0, %v1940_v12 }
  0x97   :  { %v552_v11 = vpop.permute.xlu1 %551  ;;  %v561_v15 = vpop.permute.xlu0 %560  ;;  %v1056_v52 = vsub.f32 1.0, %v2160_v45 }
  0x98   :  { %vm602_vm1 = vcmp.eq.s32.totalorder %v552_v11, %v2078_v9  ;;  %vm605_vm2 = vcmp.eq.s32.totalorder %v561_v15, %v2078_v9 }
  0x99   :  { %v2086_v14 = vsel %vm602_vm1, 1.0, %v1940_v12  ;;  %v2093_v17 = vsel %vm605_vm2, 1.0, %v1940_v12  ;;  %vm929_vm1 = vcmp.ne.s32.totalorder %v892_v33, %v2112_v27  ;;  %vm928_vm2 = vcmp.ne.s32.totalorder %v891_v36, %v2112_v27 }
  0x9a   :  { %811 = vadd.xlane.f32.xlu0 %v2086_v14  ;;  %817 = vadd.xlane.f32.xlu1 %v2093_v17  ;;  %v2224_v63 = vmul.f32 %v2083_v13, %v1056_v52  ;;  %v2227_v0 = vmul.f32 %v2086_v14, %v1055_v53  ;;  %v904_v36 = vadd.s32 120, %v2108_v24 }
  0x9b   :  { %v558_v16 = vpop.permute.xlu1 %557  ;;  %v567_v20 = vpop.permute.xlu0 %566 }
  0x9c   :  { %vm604_vm3 = vcmp.eq.s32.totalorder %v558_v16, %v2078_v9  ;;  %vm607_vm4 = vcmp.eq.s32.totalorder %v567_v20, %v2078_v9  ;;  %v902_v20 = vadd.s32 104, %v2108_v24 }
  0x9d   :  { %v2096_v18 = vsel %vm604_vm3, 1.0, %v1940_v12  ;;  %v2103_v22 = vsel %vm607_vm4, 1.0, %v1940_v12  ;;  %vm2167_vm3 = vmand %vm929_vm1, %vm942_vm8 }
  0x9e   :  { %815 = vadd.xlane.f32.xlu0 %v2096_v18  ;;  %821 = vadd.xlane.f32.xlu1 %v2103_v22  ;;  %v2192_v56 = vsel %vm2167_vm3, 1.0, %v1940_v12  ;;  %vm934_vm3 = vcmp.ne.s32.totalorder %v2219_v62, %v2112_v27 }
  0x9f   :  { %v564_v21 = vpop.permute.xlu1 %563  ;;  %v573_v25 = vpop.permute.xlu0 %572  ;;  %v1058_v1 = vsub.f32 1.0, %v2192_v56 }
  0xa0   :  { %vm606_vm5 = vcmp.eq.s32.totalorder %v564_v21, %v2078_v9  ;;  %vm609_vm6 = vcmp.eq.s32.totalorder %v573_v25, %v2078_v9  ;;  %v901_v21 = vadd.s32 96, %v2108_v24 }
  0xa1   :  { %v2106_v23 = vsel %vm606_vm5, 1.0, %v1940_v12  ;;  %v2117_v28 = vsel %vm609_vm6, 1.0, %v1940_v12  ;;  %vm945_vm6 = vmand %vm928_vm2, %vm942_vm8  ;;  %vm935_vm2 = vcmp.ne.s32.totalorder %v2209_v59, %v2112_v27 }
  0xa2   :  { %819 = vadd.xlane.f32.xlu0 %v2106_v23  ;;  %825 = vadd.xlane.f32.xlu1 %v2117_v28  ;;  %v2195_v57 = vsel %vm945_vm6, 1.0, %v1940_v12  ;;  %vm951_vm6 = vmand %vm934_vm3, %vm942_vm8 }
  0xa3   :  { %v570_v26 = vpop.permute.xlu1 %569  ;;  %v579_v31 = vpop.permute.xlu0 %578  ;;  %v1057_v2 = vsub.f32 1.0, %v2195_v57  ;;  %v2407_v33 = vsel %vm951_vm6, 1.0, %v1940_v12 }
  0xa4   :  { %vm608_vm7 = vcmp.eq.s32.totalorder %v570_v26, %v2078_v9  ;;  %vm611_vm9 = vcmp.eq.s32.totalorder %v579_v31, %v2078_v9 }
  0xa5   :  { %v2120_v29 = vsel %vm608_vm7, 1.0, %v1940_v12  ;;  %v2132_v34 = vsel %vm611_vm9, 1.0, %v1940_v12  ;;  %vm931_vm7 = vcmp.ne.s32.totalorder %v894_v39, %v2112_v27  ;;  %vm930_vm9 = vcmp.ne.s32.totalorder %v893_v42, %v2112_v27 }
  0xa6   :  { %823 = vadd.xlane.f32.xlu0 %v2120_v29  ;;  %829 = vadd.xlane.f32.xlu1 %v2132_v34  ;;  %vm947_vm13 = vmand %vm930_vm9, %vm942_vm8  ;;  %v2267_v10 = vmul.f32 %v2096_v18, %v1057_v2  ;;  %vm936_vm9 = vcmp.ne.s32.totalorder %v2259_v8, %v2112_v27 }
  0xa7   :  { %v576_v32 = vpop.permute.xlu1 %575  ;;  %v585_v37 = vpop.permute.xlu0 %584  ;;  %v2237_v4 = vsel %vm947_vm13, 1.0, %v1940_v12  ;;  %vm938_vm13 = vcmp.ne.s32.totalorder %v901_v21, %v2112_v27 }
  0xa8   :  { %vm610_vm10 = vcmp.eq.s32.totalorder %v576_v32, %v2078_v9  ;;  %vm613_vm14 = vcmp.eq.s32.totalorder %v585_v37, %v2078_v9  ;;  %v1059_v15 = vsub.f32 1.0, %v2237_v4  ;;  %v903_v37 = vadd.s32 112, %v2108_v24 }
  0xa9   :  { %v2135_v35 = vsel %vm610_vm10, 1.0, %v1940_v12  ;;  %v2150_v40 = vsel %vm613_vm14, 1.0, %v1940_v12  ;;  %vm2199_vm10 = vmand %vm931_vm7, %vm942_vm8  ;;  %vm933_vm14 = vcmp.ne.s32.totalorder %v896_v48, %v2112_v27  ;;  %vm937_vm7 = vcmp.ne.s32.totalorder %v2254_v7, %v2112_v27 }
  0xaa   :  { %827 = vadd.xlane.f32.xlu0 %v2135_v35  ;;  %833 = vadd.xlane.f32.xlu1 %v2150_v40  ;;  %v2234_v3 = vsel %vm2199_vm10, 1.0, %v1940_v12  ;;  %vm2241_vm0 = vmand %vm933_vm14, %vm942_vm8  ;;  %v2399_v26 = vmul.f32 %v2106_v23, %v1059_v15 }
  0xab   :  { %v582_v38 = vpop.permute.xlu1 %581  ;;  %v591_v43 = vpop.permute.xlu0 %590  ;;  %v1060_v11 = vsub.f32 1.0, %v2234_v3  ;;  %v2370_v16 = vsel %vm2241_vm0, 1.0, %v1940_v12  ;;  %vm954_vm10 = vmand %vm937_vm7, %vm942_vm8  ;;  %vm941_vm0 = vcmp.ne.s32.totalorder %v904_v36, %v2112_v27 }
  0xac   :  { %vm612_vm15 = vcmp.eq.s32.totalorder %v582_v38, %v2078_v9  ;;  %vm615_vm4 = vcmp.eq.s32.totalorder %v591_v43, %v2078_v9  ;;  %v1062_v30 = vsub.f32 1.0, %v2370_v16  ;;  %v1063_v43 = vsub.f32 1.0, %v2407_v33 }
  0xad   :  { %v2153_v41 = vsel %vm612_vm15, 1.0, %v1940_v12  ;;  %v2178_v49 = vsel %vm615_vm4, 1.0, %v1940_v12  ;;  %vm932_vm15 = vcmp.ne.s32.totalorder %v895_v51, %v2112_v27  ;;  %vm35_vm4 = vcmask 7168  }
  0xae   :  { %831 = vadd.xlane.f32.xlu0 %v2153_v41  ;;  %837 = vadd.xlane.f32.xlu1 %v2178_v49  ;;  %vm2247_vm1 = vmand %vm932_vm15, %vm942_vm8  ;;  %84 = vst.msk [vmem:[#allocation5] sm:$0xff] %vm35_vm4, %v1940_v12  ;;  %v2396_v25 = vmul.f32 %v2103_v22, %v1060_v11  ;;  %v2420_v38 = vmul.f32 %v2117_v28, %v1062_v30  ;;  %v1941_v11 = vmov -inf  }
  0xaf   :  { %v588_v44 = vpop.permute.xlu1 %587  ;;  %v597_v54 = vpop.permute.xlu0 %596  ;;  %52 = vst.msk [vmem:[#allocation3] sm:$0xff] %vm35_vm4, %v1940_v12  ;;  %53 = vst.msk [vmem:[#allocation3 + $0x8] sm:$0xff] %vm35_vm4, %v1940_v12  ;;  %v2375_v19 = vsel %vm2247_vm1, 1.0, %v1940_v12  ;;  %vm940_vm1 = vcmp.ne.s32.totalorder %v903_v37, %v2112_v27  ;;  %v2445_v48 = vmul.f32 %v2135_v35, %v1063_v43 }
  0xb0   :  { %vm614_vm5 = vcmp.eq.s32.totalorder %v588_v44, %v2078_v9  ;;  %vm617_vm11 = vcmp.eq.s32.totalorder %v597_v54, %v2078_v9  ;;  %54 = vst.msk [vmem:[#allocation3 + $0x10] sm:$0xff] %vm35_vm4, %v1940_v12  ;;  %55 = vst.msk [vmem:[#allocation3 + $0x18] sm:$0xff] %vm35_vm4, %v1940_v12  ;;  %v1061_v31 = vsub.f32 1.0, %v2375_v19  ;;  %v2428_v44 = vsel %vm954_vm10, 1.0, %v1940_v12 }
  0xb1   :  { %v2181_v50 = vsel %vm614_vm5, 1.0, %v1940_v12  ;;  %v2212_v60 = vsel %vm617_vm11, 1.0, %v1940_v12  ;;  %56 = vst.msk [vmem:[#allocation3 + $0x20] sm:$0xff] %vm35_vm4, %v1940_v12  ;;  %57 = vst.msk [vmem:[#allocation3 + $0x28] sm:$0xff] %vm35_vm4, %v1940_v12  ;;  %v1066_v51 = vsub.f32 1.0, %v2428_v44 }
  0xb2   :  { %835 = vadd.xlane.f32.xlu0 %v2181_v50  ;;  %841 = vadd.xlane.f32.xlu1 %v2212_v60  ;;  %58 = vst.msk [vmem:[#allocation3 + $0x30] sm:$0xff] %vm35_vm4, %v1940_v12  ;;  %59 = vst.msk [vmem:[#allocation3 + $0x38] sm:$0xff] %vm35_vm4, %v1940_v12  ;;  %v2423_v39 = vmul.f32 %v2120_v29, %v1061_v31 }
  0xb3   :  { %v594_v55 = vpop.permute.xlu1 %593  ;;  %60 = vst.msk [vmem:[#allocation3 + $0x40] sm:$0xff] %vm35_vm4, %v1940_v12  ;;  %61 = vst.msk [vmem:[#allocation3 + $0x48] sm:$0xff] %vm35_vm4, %v1940_v12 }
  0xb4   :  { %vm616_vm12 = vcmp.eq.s32.totalorder %v594_v55, %v2078_v9  ;;  %v2264_v9 = vmul.f32 %v2093_v17, %v1058_v1  ;;  %62 = vst.msk [vmem:[#allocation3 + $0x50] sm:$0xff] %vm35_vm4, %v1940_v12  ;;  %63 = vst.msk [vmem:[#allocation3 + $0x58] sm:$0xff] %vm35_vm4, %v1940_v12  ;;  %v2462_v55 = vmul.f32 %v2150_v40, %v1066_v51 }
  0xb5   :  { %v2215_v61 = vsel %vm616_vm12, 1.0, %v1940_v12  ;;  %64 = vst.msk [vmem:[#allocation3 + $0x60] sm:$0xff] %vm35_vm4, %v1940_v12  ;;  %65 = vst.msk [vmem:[#allocation3 + $0x68] sm:$0xff] %vm35_vm4, %v1940_v12  ;;  %vm939_vm12 = vcmp.ne.s32.totalorder %v902_v20, %v2112_v27  ;;  %v795_v15 = vld [vmem:[#allocation5] sm:$0xff] }
  0xb6   :  { %839 = vadd.xlane.f32.xlu0 %v2215_v61  ;;  %1201 = vadd.xlane.f32.xlu1 %v2224_v63  ;;  %66 = vst.msk [vmem:[#allocation3 + $0x70] sm:$0xff] %vm35_vm4, %v1940_v12  ;;  %67 = vst.msk [vmem:[#allocation3 + $0x78] sm:$0xff] %vm35_vm4, %v1940_v12 }
  0xb7   :  { %68 = vst.msk [vmem:[#allocation4] sm:$0xff] %vm35_vm4, %v1940_v12  ;;  %69 = vst.msk [vmem:[#allocation4 + $0x8] sm:$0xff] %vm35_vm4, %v1940_v12 }
  0xb8   :  { %70 = vst.msk [vmem:[#allocation4 + $0x10] sm:$0xff] %vm35_vm4, %v1940_v12  ;;  %71 = vst.msk [vmem:[#allocation4 + $0x18] sm:$0xff] %vm35_vm4, %v1940_v12 }
  0xb9   :  { %72 = vst.msk [vmem:[#allocation4 + $0x20] sm:$0xff] %vm35_vm4, %v1940_v12  ;;  %73 = vst.msk [vmem:[#allocation4 + $0x28] sm:$0xff] %vm35_vm4, %v1940_v12 }
  0xba   :  { %1199 = vadd.xlane.f32.xlu0 %v2227_v0  ;;  %74 = vst.msk [vmem:[#allocation4 + $0x30] sm:$0xff] %vm35_vm4, %v1940_v12  ;;  %75 = vst.msk [vmem:[#allocation4 + $0x38] sm:$0xff] %vm35_vm4, %v1940_v12  ;;  %1205 = vadd.xlane.f32.xlu1 %v2264_v9 }
  0xbb   :  { %76 = vst.msk [vmem:[#allocation4 + $0x40] sm:$0xff] %vm35_vm4, %v1940_v12  ;;  %77 = vst.msk [vmem:[#allocation4 + $0x48] sm:$0xff] %vm35_vm4, %v1940_v12 }
  0xbc   :  { %78 = vst.msk [vmem:[#allocation4 + $0x50] sm:$0xff] %vm35_vm4, %v1940_v12  ;;  %79 = vst.msk [vmem:[#allocation4 + $0x58] sm:$0xff] %vm35_vm4, %v1940_v12 }
  0xbd   :  { %80 = vst.msk [vmem:[#allocation4 + $0x60] sm:$0xff] %vm35_vm4, %v1940_v12  ;;  %81 = vst.msk [vmem:[#allocation4 + $0x68] sm:$0xff] %vm35_vm4, %v1940_v12 }
  0xbe   :  { %82 = vst.msk [vmem:[#allocation4 + $0x70] sm:$0xff] %vm35_vm4, %v1940_v12  ;;  %83 = vst.msk [vmem:[#allocation4 + $0x78] sm:$0xff] %vm35_vm4, %v1940_v12  ;;  %1203 = vadd.xlane.f32.xlu0 %v2267_v10  ;;  %1209 = vadd.xlane.f32.xlu1 %v2396_v25 }
  0xbf   :  { %85 = vst.msk [vmem:[#allocation5 + $0x8] sm:$0xff] %vm35_vm4, %v1940_v12  ;;  %86 = vst.msk [vmem:[#allocation5 + $0x10] sm:$0xff] %vm35_vm4, %v1940_v12 }
  0xc0   :  { %87 = vst.msk [vmem:[#allocation5 + $0x18] sm:$0xff] %vm35_vm4, %v1940_v12  ;;  %88 = vst.msk [vmem:[#allocation5 + $0x20] sm:$0xff] %vm35_vm4, %v1940_v12 }
  0xc1   :  { %89 = vst.msk [vmem:[#allocation5 + $0x28] sm:$0xff] %vm35_vm4, %v1940_v12  ;;  %90 = vst.msk [vmem:[#allocation5 + $0x30] sm:$0xff] %vm35_vm4, %v1940_v12 }
  0xc2   :  { %91 = vst.msk [vmem:[#allocation5 + $0x38] sm:$0xff] %vm35_vm4, %v1940_v12  ;;  %92 = vst.msk [vmem:[#allocation5 + $0x40] sm:$0xff] %vm35_vm4, %v1940_v12  ;;  %1207 = vadd.xlane.f32.xlu0 %v2399_v26  ;;  %1213 = vadd.xlane.f32.xlu1 %v2420_v38 }
  0xc3   :  { %93 = vst.msk [vmem:[#allocation5 + $0x48] sm:$0xff] %vm35_vm4, %v1940_v12  ;;  %94 = vst.msk [vmem:[#allocation5 + $0x50] sm:$0xff] %vm35_vm4, %v1940_v12 }
  0xc4   :  { %95 = vst.msk [vmem:[#allocation5 + $0x58] sm:$0xff] %vm35_vm4, %v1940_v12  ;;  %96 = vst.msk [vmem:[#allocation5 + $0x60] sm:$0xff] %vm35_vm4, %v1940_v12 }
  0xc5   :  { %97 = vst.msk [vmem:[#allocation5 + $0x68] sm:$0xff] %vm35_vm4, %v1940_v12  ;;  %98 = vst.msk [vmem:[#allocation5 + $0x70] sm:$0xff] %vm35_vm4, %v1940_v12 }
  0xc6   :  { %99 = vst.msk [vmem:[#allocation5 + $0x78] sm:$0xff] %vm35_vm4, %v1940_v12  ;;  %vm952_vm5 = vmand %vm935_vm2, %vm942_vm8  ;;  %1211 = vadd.xlane.f32.xlu0 %v2423_v39  ;;  %v796_v20 = vld [vmem:[#allocation5 + $0x8] sm:$0xff] }
  0xc7   :  { %v2404_v32 = vsel %vm952_vm5, 1.0, %v1940_v12  ;;  %vm953_vm11 = vmand %vm936_vm9, %vm942_vm8  ;;  %3210 = vst [vmem:[#allocation10_spill] sm:$0xff] %v2420_v38 }
  0xc8   :  { %3211 = vst [vmem:[#allocation11_spill] sm:$0xff] %v2423_v39  ;;  %v1064_v42 = vsub.f32 1.0, %v2404_v32  ;;  %v2431_v47 = vsel %vm953_vm11, 1.0, %v1940_v12  ;;  %vm956_vm14 = vmand %vm939_vm12, %vm942_vm8 }
  0xc9   :  { %vm955_vm15 = vmand %vm938_vm13, %vm942_vm8  ;;  %3213 = vst [vmem:[#allocation13_spill] sm:$0xff] %v2445_v48  ;;  %v1065_v52 = vsub.f32 1.0, %v2431_v47  ;;  %v2450_v53 = vsel %vm956_vm14, 1.0, %v1940_v12 }
  0xca   :  { %v2442_v24 = vmul.f32 %v2132_v34, %v1064_v42  ;;  %v2453_v54 = vsel %vm955_vm15, 1.0, %v1940_v12  ;;  %vm958_vm2 = vmand %vm941_vm0, %vm942_vm8  ;;  %1215 = vadd.xlane.f32.xlu0 %v2445_v48  ;;  %3214 = vst [vmem:[#allocation14_spill] sm:$0xff] %v2462_v55  ;;  %v1068_v59 = vsub.f32 1.0, %v2450_v53 }
  0xcb   :  { %vm957_vm3 = vmand %vm940_vm1, %vm942_vm8  ;;  %v2465_v58 = vmul.f32 %v2153_v41, %v1065_v52  ;;  %v1067_v62 = vsub.f32 1.0, %v2453_v54  ;;  %v2470_v1 = vsel %vm958_vm2, 1.0, %v1940_v12  ;;  %45 = vst.msk [vmem:[#allocation2 + $0x48] sm:$0xff] %vm35_vm4, %v1941_v11  ;;  %v797_v52 = vld [vmem:[#allocation5 + $0x10] sm:$0xff] }
  0xcc   :  { %3212 = vst [vmem:[#allocation12_spill] sm:$0xff] %v2442_v24  ;;  %1217 = vadd.xlane.f32.xlu1 %v2442_v24  ;;  %v2473_v27 = vsel %vm957_vm3, 1.0, %v1940_v12  ;;  %v2478_v2 = vmul.f32 %v2178_v49, %v1068_v59  ;;  %v1070_v6 = vsub.f32 1.0, %v2470_v1  ;;  %36 = vst.msk [vmem:[#allocation2] sm:$0xff] %vm35_vm4, %v1941_v11  ;;  %v798_v59 = vld [vmem:[#allocation5 + $0x18] sm:$0xff]  ;;  %v804_v24 = vld [vmem:[#allocation5 + $0x48] sm:$0xff] }
  0xcd   :  { %3215 = vst [vmem:[#allocation15_spill] sm:$0xff] %v2465_v58  ;;  %v2481_v5 = vmul.f32 %v2181_v50, %v1067_v62  ;;  %v1069_v7 = vsub.f32 1.0, %v2473_v27  ;;  %37 = vst.msk [vmem:[#allocation2 + $0x8] sm:$0xff] %vm35_vm4, %v1941_v11 }
  0xce   :  { %1219 = vadd.xlane.f32.xlu0 %v2465_v58  ;;  %3216 = vst [vmem:[#allocation16_spill] sm:$0xff] %v2478_v2  ;;  %v2488_v12 = vmul.f32 %v2212_v60, %v1070_v6  ;;  %38 = vst.msk [vmem:[#allocation2 + $0x10] sm:$0xff] %vm35_vm4, %v1941_v11 }
  0xcf   :  { %3217 = vst [vmem:[#allocation17_spill] sm:$0xff] %v2481_v5  ;;  %v2491_v8 = vmul.f32 %v2215_v61, %v1069_v7  ;;  %39 = vst.msk [vmem:[#allocation2 + $0x18] sm:$0xff] %vm35_vm4, %v1941_v11 }
  0xd0   :  { %1221 = vadd.xlane.f32.xlu1 %v2462_v55  ;;  %3218 = vst [vmem:[#allocation18_spill] sm:$0xff] %v2488_v12  ;;  %40 = vst.msk [vmem:[#allocation2 + $0x20] sm:$0xff] %vm35_vm4, %v1941_v11 }
  0xd1   :  { %3219 = vst [vmem:[#allocation19_spill] sm:$0xff] %v2491_v8  ;;  %41 = vst.msk [vmem:[#allocation2 + $0x28] sm:$0xff] %vm35_vm4, %v1941_v11 }
  0xd2   :  { %1223 = vadd.xlane.f32.xlu0 %v2481_v5  ;;  %42 = vst.msk [vmem:[#allocation2 + $0x30] sm:$0xff] %vm35_vm4, %v1941_v11  ;;  %43 = vst.msk [vmem:[#allocation2 + $0x38] sm:$0xff] %vm35_vm4, %v1941_v11 }
  0xd3   :  { %44 = vst.msk [vmem:[#allocation2 + $0x40] sm:$0xff] %vm35_vm4, %v1941_v11  ;;  %46 = vst.msk [vmem:[#allocation2 + $0x50] sm:$0xff] %vm35_vm4, %v1941_v11 }
  0xd4   :  { %1225 = vadd.xlane.f32.xlu1 %v2478_v2  ;;  %47 = vst.msk [vmem:[#allocation2 + $0x58] sm:$0xff] %vm35_vm4, %v1941_v11  ;;  %48 = vst.msk [vmem:[#allocation2 + $0x60] sm:$0xff] %vm35_vm4, %v1941_v11 }
  0xd5   :  { %49 = vst.msk [vmem:[#allocation2 + $0x68] sm:$0xff] %vm35_vm4, %v1941_v11  ;;  %50 = vst.msk [vmem:[#allocation2 + $0x70] sm:$0xff] %vm35_vm4, %v1941_v11 }
  0xd6   :  { %1227 = vadd.xlane.f32.xlu0 %v2491_v8  ;;  %51 = vst.msk [vmem:[#allocation2 + $0x78] sm:$0xff] %vm35_vm4, %v1941_v11 }
  0xd8   :  { %1229 = vadd.xlane.f32.xlu1 %v2488_v12 }
 0x123   :  { %v814_v30 = vpop.xlane.xlu1 %813 }
 0x124   :  { %v844_v42 = vadd.f32 %v814_v30, %v796_v20 }
 0x126   :  { %860 = vst.msk [vmem:[#allocation5 + $0x8] sm:$0xff] %vm35_vm4, %v844_v42  ;;  %v800_v42 = vld [vmem:[#allocation5 + $0x28] sm:$0xff] }
 0x127   :  { %v812_v21 = vpop.xlane.xlu0 %811  ;;  %v818_v7 = vpop.xlane.xlu1 %817 }
 0x128   :  { %v2511_v31 = vpop.f32.mrb[0].mxu0  ;;  %v2513_v36 = vpop.f32.mrb[0].mxu1  ;;  %v843_v37 = vadd.f32 %v812_v21, %v795_v15  ;;  %v846_v21 = vadd.f32 %v818_v7, %v798_v59 }
 0x129   :  { %327 = vmax.xlane.f32.xlu1 %v2513_v36  ;;  %v2516_v43 = vpop.f32.mrb[1].mxu1  ;;  %311 = vmax.xlane.f32.xlu0 %v2511_v31  ;;  %v2519_v51 = vpop.f32.mrb[1].mxu0  ;;  %v716_v62 = vmul.f32 %v2511_v31, %v2083_v13  ;;  %v724_v13 = vmul.f32 %v2513_v36, %v2132_v34  ;;  %v1104_v34 = vmul.f32 %v2511_v31, %v2224_v63 }
 0x12a   :  { %859 = vst.msk [vmem:[#allocation5] sm:$0xff] %vm35_vm4, %v843_v37  ;;  %v799_v37 = vld [vmem:[#allocation5 + $0x20] sm:$0xff]  ;;  %862 = vst.msk [vmem:[#allocation5 + $0x18] sm:$0xff] %vm35_vm4, %v846_v21  ;;  %v802_v21 = vld [vmem:[#allocation5 + $0x38] sm:$0xff] }
 0x12b   :  { %v816_v6 = vpop.xlane.xlu0 %815  ;;  %v822_v5 = vpop.xlane.xlu1 %821 }
 0x12c   :  { %v2525_v11 = vpop.f32.mrb[2].mxu0  ;;  %v2527_v15 = vpop.f32.mrb[2].mxu1  ;;  %v845_v20 = vadd.f32 %v816_v6, %v797_v52  ;;  %v848_v6 = vadd.f32 %v822_v5, %v800_v42 }
 0x12d   :  { %v2529_v30 = vpop.f32.mrb[3].mxu1  ;;  %733 = vadd.xlane.f32.xlu1 %v716_v62  ;;  %309 = vmax.xlane.f32.xlu0 %v2519_v51  ;;  %v2532_v8 = vpop.f32.mrb[3].mxu0 }
 0x12e   :  { %861 = vst.msk [vmem:[#allocation5 + $0x10] sm:$0xff] %vm35_vm4, %v845_v20  ;;  %v801_v20 = vld [vmem:[#allocation5 + $0x30] sm:$0xff]  ;;  %864 = vst.msk [vmem:[#allocation5 + $0x28] sm:$0xff] %vm35_vm4, %v848_v6  ;;  %v803_v6 = vld [vmem:[#allocation5 + $0x40] sm:$0xff] }
 0x12f   :  { %v820_v12 = vpop.xlane.xlu0 %819 }
 0x130   :  { %v2538_v52 = vpop.f32.mrb[4].mxu0  ;;  %v2540_v59 = vpop.f32.mrb[4].mxu1  ;;  %v847_v62 = vadd.f32 %v820_v12, %v799_v37  ;;  %v715_v12 = vmul.f32 %v2086_v14, %v2519_v51  ;;  %v723_v14 = vmul.f32 %v2135_v35, %v2516_v43 }
 0x131   :  { %v2542_v7 = vpop.f32.mrb[5].mxu1  ;;  %749 = vadd.xlane.f32.xlu1 %v724_v13  ;;  %325 = vmax.xlane.f32.xlu0 %v2516_v43  ;;  %v2545_v2 = vpop.f32.mrb[5].mxu0 }
 0x132   :  { %863 = vst.msk [vmem:[#allocation5 + $0x20] sm:$0xff] %vm35_vm4, %v847_v62  ;;  %v826_v37 = vpop.xlane.xlu1 %825 }
 0x133   :  { %v824_v5 = vpop.xlane.xlu0 %823  ;;  %v850_v55 = vadd.f32 %v826_v37, %v802_v21  ;;  %v805_v21 = vld [vmem:[#allocation5 + $0x50] sm:$0xff] }
 0x134   :  { %v2553_v42 = vpop.f32.mrb[6].mxu0  ;;  %v2555_v13 = vpop.f32.mrb[6].mxu1  ;;  %v849_v58 = vadd.f32 %v824_v5, %v801_v20 }
 0x135   :  { %v2557_v48 = vpop.f32.mrb[7].mxu1  ;;  %1121 = vadd.xlane.f32.xlu1 %v1104_v34  ;;  %731 = vadd.xlane.f32.xlu0 %v715_v12  ;;  %v2559_v62 = vpop.f32.mrb[7].mxu0  ;;  %866 = vst.msk [vmem:[#allocation5 + $0x38] sm:$0xff] %vm35_vm4, %v850_v55  ;;  %v806_v34 = vld [vmem:[#allocation5 + $0x58] sm:$0xff] }
 0x136   :  { %865 = vst.msk [vmem:[#allocation5 + $0x30] sm:$0xff] %vm35_vm4, %v849_v58  ;;  %v830_v39 = vpop.xlane.xlu1 %829  ;;  %v1103_v58 = vmul.f32 %v2227_v0, %v2519_v51  ;;  %v809_v0 = vld [vmem:[#allocation5 + $0x70] sm:$0xff] }
 0x137   :  { %v828_v63 = vpop.xlane.xlu0 %827  ;;  %v852_v20 = vadd.f32 %v830_v39, %v804_v24  ;;  %v807_v39 = vld [vmem:[#allocation5 + $0x60] sm:$0xff]  ;;  %v808_v24 = vld [vmem:[#allocation5 + $0x68] sm:$0xff] }
 0x138   :  { %v851_v38 = vadd.f32 %v828_v63, %v803_v6  ;;  %v810_v63 = vld [vmem:[#allocation5 + $0x78] sm:$0xff] }
 0x139   :  { %747 = vadd.xlane.f32.xlu0 %v723_v14  ;;  %315 = vmax.xlane.f32.xlu1 %v2525_v11  ;;  %868 = vst.msk [vmem:[#allocation5 + $0x48] sm:$0xff] %vm35_vm4, %v852_v20  ;;  %v718_v20 = vmul.f32 %v2525_v11, %v2093_v17  ;;  %v725_v17 = vmul.f32 %v2153_v41, %v2529_v30 }
 0x13a   :  { %867 = vst.msk [vmem:[#allocation5 + $0x40] sm:$0xff] %vm35_vm4, %v851_v38  ;;  %v834_v12 = vpop.xlane.xlu1 %833 }
 0x13b   :  { %v832_v55 = vpop.xlane.xlu0 %831  ;;  %v854_v35 = vadd.f32 %v834_v12, %v806_v34 }
 0x13c   :  { %v853_v5 = vadd.f32 %v832_v55, %v805_v21  ;;  %v717_v21 = vmul.f32 %v2096_v18, %v2532_v8 }
 0x13d   :  { %1119 = vadd.xlane.f32.xlu0 %v1103_v58  ;;  %331 = vmax.xlane.f32.xlu1 %v2527_v15  ;;  %870 = vst.msk [vmem:[#allocation5 + $0x58] sm:$0xff] %vm35_vm4, %v854_v35  ;;  %v1184_v35 = vld [vmem:[#allocation5 + $0x8] sm:$0xff] }
 0x13e   :  { %869 = vst.msk [vmem:[#allocation5 + $0x50] sm:$0xff] %vm35_vm4, %v853_v5  ;;  %v838_v38 = vpop.xlane.xlu1 %837  ;;  %v1183_v5 = vld [vmem:[#allocation5] sm:$0xff] }
 0x13f   :  { %v836_v37 = vpop.xlane.xlu0 %835  ;;  %v856_v14 = vadd.f32 %v838_v38, %v808_v24 }
 0x140   :  { %v855_v6 = vadd.f32 %v836_v37, %v807_v39  ;;  %v726_v39 = vmul.f32 %v2527_v15, %v2150_v40  ;;  %v1105_v40 = vmul.f32 %v2267_v10, %v2532_v8  ;;  %v1190_v10 = vld [vmem:[#allocation5 + $0x38] sm:$0xff] }
 0x141   :  { %329 = vmax.xlane.f32.xlu0 %v2529_v30  ;;  %313 = vmax.xlane.f32.xlu1 %v2532_v8  ;;  %872 = vst.msk [vmem:[#allocation5 + $0x68] sm:$0xff] %vm35_vm4, %v856_v14  ;;  %v1186_v14 = vld [vmem:[#allocation5 + $0x18] sm:$0xff] }
 0x142   :  { %871 = vst.msk [vmem:[#allocation5 + $0x60] sm:$0xff] %vm35_vm4, %v855_v6  ;;  %v842_v58 = vpop.xlane.xlu1 %841  ;;  %v1185_v6 = vld [vmem:[#allocation5 + $0x10] sm:$0xff] }
 0x143   :  { %v840_v34 = vpop.xlane.xlu0 %839  ;;  %v858_v12 = vadd.f32 %v842_v58, %v810_v63  ;;  %v1188_v58 = vld [vmem:[#allocation5 + $0x28] sm:$0xff] }
 0x144   :  { %v857_v55 = vadd.f32 %v840_v34, %v809_v0  ;;  %v1106_v0 = vmul.f32 %v2525_v11, %v2264_v9  ;;  %v1187_v34 = vld [vmem:[#allocation5 + $0x20] sm:$0xff]  ;;  %v1189_v9 = vld [vmem:[#allocation5 + $0x30] sm:$0xff] }
 0x145   :  { %737 = vadd.xlane.f32.xlu1 %v718_v20  ;;  %735 = vadd.xlane.f32.xlu0 %v717_v21  ;;  %874 = vst.msk [vmem:[#allocation5 + $0x78] sm:$0xff] %vm35_vm4, %v858_v12 }
 0x146   :  { %873 = vst.msk [vmem:[#allocation5 + $0x70] sm:$0xff] %vm35_vm4, %v857_v55  ;;  %v1202_v18 = vpop.xlane.xlu1 %1201 }
 0x147   :  { %v1200_v24 = vpop.xlane.xlu0 %1199  ;;  %v1232_v38 = vsub.f32 %v1184_v35, %v1202_v18 }
 0x148   :  { %v1231_v37 = vsub.f32 %v1183_v5, %v1200_v24 }
 0x149   :  { %753 = vadd.xlane.f32.xlu1 %v726_v39  ;;  %751 = vadd.xlane.f32.xlu0 %v725_v17  ;;  %1248 = vst.msk [vmem:[#allocation5 + $0x8] sm:$0xff] %vm35_vm4, %v1232_v38  ;;  %v1192_v38 = vld [vmem:[#allocation5 + $0x48] sm:$0xff] }
 0x14a   :  { %1247 = vst.msk [vmem:[#allocation5] sm:$0xff] %vm35_vm4, %v1231_v37  ;;  %v1206_v41 = vpop.xlane.xlu1 %1205  ;;  %v1191_v37 = vld [vmem:[#allocation5 + $0x40] sm:$0xff] }
 0x14b   :  { %v1204_v63 = vpop.xlane.xlu0 %1203  ;;  %v1234_v21 = vsub.f32 %v1186_v14, %v1206_v41  ;;  %v719_v14 = vmul.f32 %v2106_v23, %v2545_v2 }
 0x14c   :  { %v1233_v20 = vsub.f32 %v1185_v6, %v1204_v63  ;;  %v720_v6 = vmul.f32 %v2538_v52, %v2103_v22  ;;  %v727_v22 = vmul.f32 %v2181_v50, %v2542_v7 }
 0x14d   :  { %1125 = vadd.xlane.f32.xlu1 %v1106_v0  ;;  %1123 = vadd.xlane.f32.xlu0 %v1105_v40  ;;  %1250 = vst.msk [vmem:[#allocation5 + $0x18] sm:$0xff] %vm35_vm4, %v1234_v21  ;;  %v1194_v21 = vld [vmem:[#allocation5 + $0x58] sm:$0xff]  ;;  %v1197_v50 = vld [vmem:[#allocation5 + $0x70] sm:$0xff] }
 0x14e   :  { %1249 = vst.msk [vmem:[#allocation5 + $0x10] sm:$0xff] %vm35_vm4, %v1233_v20  ;;  %v1210_v12 = vpop.xlane.xlu1 %1209  ;;  %v1193_v20 = vld [vmem:[#allocation5 + $0x50] sm:$0xff] }
 0x14f   :  { %v1208_v55 = vpop.xlane.xlu0 %1207  ;;  %v1236_v35 = vsub.f32 %v1188_v58, %v1210_v12 }
 0x150   :  { %v1235_v5 = vsub.f32 %v1187_v34, %v1208_v55  ;;  %v728_v34 = vmul.f32 %v2540_v59, %v2178_v49 }
 0x151   :  { %319 = vmax.xlane.f32.xlu1 %v2538_v52  ;;  %317 = vmax.xlane.f32.xlu0 %v2545_v2  ;;  %1252 = vst.msk [vmem:[#allocation5 + $0x28] sm:$0xff] %vm35_vm4, %v1236_v35  ;;  %v1196_v35 = vld [vmem:[#allocation5 + $0x68] sm:$0xff] }
 0x152   :  { %1251 = vst.msk [vmem:[#allocation5 + $0x20] sm:$0xff] %vm35_vm4, %v1235_v5  ;;  %v1214_v17 = vpop.xlane.xlu1 %1213  ;;  %v1195_v5 = vld [vmem:[#allocation5 + $0x60] sm:$0xff] }
 0x153   :  { %v1212_v39 = vpop.xlane.xlu0 %1211  ;;  %v1238_v18 = vsub.f32 %v1190_v10, %v1214_v17 }
 0x154   :  { %v1237_v24 = vsub.f32 %v1189_v9, %v1212_v39  ;;  %v1107_v9 = vmul.f32 %v2399_v26, %v2545_v2  ;;  %v722_v26 = vmul.f32 %v2553_v42, %v2117_v28 }
 0x155   :  { %335 = vmax.xlane.f32.xlu1 %v2540_v59  ;;  %333 = vmax.xlane.f32.xlu0 %v2542_v7  ;;  %1254 = vst.msk [vmem:[#allocation5 + $0x38] sm:$0xff] %vm35_vm4, %v1238_v18 }
 0x156   :  { %1253 = vst.msk [vmem:[#allocation5 + $0x30] sm:$0xff] %vm35_vm4, %v1237_v24  ;;  %v1198_v24 = vld [vmem:[#allocation5 + $0x78] sm:$0xff] }
 0x157   :  { %v1216_v0 = vpop.xlane.xlu0 %1215 }
 0x158   :  { %v1239_v63 = vsub.f32 %v1191_v37, %v1216_v0  ;;  %v721_v0 = vmul.f32 %v2120_v29, %v2559_v62  ;;  %v2643_v29 = vld [vmem:[#allocation2] sm:$0xff] }
 0x159   :  { %v1218_v40 = vpop.xlane.xlu1 %1217  ;;  %741 = vadd.xlane.f32.xlu1 %v720_v6  ;;  %739 = vadd.xlane.f32.xlu0 %v719_v14  ;;  %v730_v14 = vmul.f32 %v2555_v13, %v2212_v60 }
 0x15a   :  { %v1240_v41 = vsub.f32 %v1192_v38, %v1218_v40  ;;  %1255 = vst.msk [vmem:[#allocation5 + $0x40] sm:$0xff] %vm35_vm4, %v1239_v63  ;;  %v729_v40 = vmul.f32 %v2215_v61, %v2557_v48  ;;  %v2633_v63 = vld [vmem:[#allocation2 + $0x48] sm:$0xff] }
 0x15b   :  { %v1220_v58 = vpop.xlane.xlu0 %1219 }
 0x15c   :  { %1256 = vst.msk [vmem:[#allocation5 + $0x48] sm:$0xff] %vm35_vm4, %v1240_v41  ;;  %v1241_v55 = vsub.f32 %v1193_v20, %v1220_v58  ;;  %v2635_v41 = vld [vmem:[#allocation2 + $0x8] sm:$0xff] }
 0x15d   :  { %v1222_v23 = vpop.xlane.xlu1 %1221  ;;  %757 = vadd.xlane.f32.xlu1 %v728_v34  ;;  %755 = vadd.xlane.f32.xlu0 %v727_v22  ;;  %v700_v34 = vld [vmem:[#allocation4 + $0x8] sm:$0xff] }
 0x15e   :  { %v1242_v12 = vsub.f32 %v1194_v21, %v1222_v23  ;;  %1257 = vst.msk [vmem:[#allocation5 + $0x50] sm:$0xff] %vm35_vm4, %v1241_v55 }
 0x15f   :  { %v1224_v10 = vpop.xlane.xlu0 %1223 }
 0x160   :  { %1258 = vst.msk [vmem:[#allocation5 + $0x58] sm:$0xff] %vm35_vm4, %v1242_v12  ;;  %v1243_v39 = vsub.f32 %v1195_v5, %v1224_v10  ;;  %v708_v5 = vld [vmem:[#allocation4 + $0x48] sm:$0xff] }
 0x161   :  { %v1226_v49 = vpop.xlane.xlu1 %1225  ;;  %1127 = vadd.xlane.f32.xlu0 %v1107_v9  ;;  %323 = vmax.xlane.f32.xlu1 %v2553_v42 }
 0x162   :  { %v1244_v17 = vsub.f32 %v1196_v35, %v1226_v49  ;;  %1259 = vst.msk [vmem:[#allocation5 + $0x60] sm:$0xff] %vm35_vm4, %v1243_v39  ;;  %v2658_v35 = vld [vmem:[#allocation2 + $0x40] sm:$0xff] }
 0x163   :  { %v1228_v18 = vpop.xlane.xlu0 %1227 }
 0x164   :  { %1260 = vst.msk [vmem:[#allocation5 + $0x68] sm:$0xff] %vm35_vm4, %v1244_v17  ;;  %v1245_v38 = vsub.f32 %v1197_v50, %v1228_v18  ;;  %v699_v50 = vld [vmem:[#allocation4] sm:$0xff] }
 0x165   :  { %v1230_v37 = vpop.xlane.xlu1 %1229  ;;  %339 = vmax.xlane.f32.xlu1 %v2555_v13  ;;  %321 = vmax.xlane.f32.xlu0 %v2559_v62 }
 0x166   :  { %v1246_v6 = vsub.f32 %v1198_v24, %v1230_v37  ;;  %1261 = vst.msk [vmem:[#allocation5 + $0x70] sm:$0xff] %vm35_vm4, %v1245_v38 }
 0x168   :  { %1262 = vst.msk [vmem:[#allocation5 + $0x78] sm:$0xff] %vm35_vm4, %v1246_v6 }
 0x169   :  { %745 = vadd.xlane.f32.xlu1 %v722_v26  ;;  %337 = vmax.xlane.f32.xlu0 %v2557_v48  ;;  %v707_v26 = vld [vmem:[#allocation4 + $0x40] sm:$0xff] }
 0x16d   :  { %761 = vadd.xlane.f32.xlu1 %v730_v14  ;;  %743 = vadd.xlane.f32.xlu0 %v721_v0  ;;  %v2675_v14 = vld [vmem:[#allocation2 + $0x18] sm:$0xff] }
 0x171   :  { %759 = vadd.xlane.f32.xlu0 %v729_v40 }
 0x1b6   :  { %v328_v28 = vpop.xlane.xlu1 %327  ;;  %v312_v20 = vpop.xlane.xlu0 %311 }
 0x1b7   :  { %v2638_v21 = vmax.f32 %v2633_v63, %v328_v28  ;;  %v2641_v60 = vmax.f32 %v2635_v41, %v312_v20 }
 0x1b9   :  { %1352 = vst.msk [vmem:[#allocation2 + $0x48] sm:$0xff] %vm35_vm4, %v2638_v21  ;;  %1344 = vst.msk [vmem:[#allocation2 + $0x8] sm:$0xff] %vm35_vm4, %v2641_v60  ;;  %452 = vperm.xlu0 %1783, %v2638_v21   ;;  %412 = vperm.xlu1 %1782, %v2641_v60  }
 0x1ba   :  { %v734_v58 = vpop.xlane.xlu1 %733  ;;  %v310_v23 = vpop.xlane.xlu0 %309 }
 0x1bb   :  { %v764_v55 = vadd.f32 %v734_v58, %v700_v34  ;;  %v2656_v12 = vmax.f32 %v2643_v29, %v310_v23  ;;  %v2682_v58 = vld [vmem:[#allocation2 + $0x58] sm:$0xff] }
 0x1bd   :  { %780 = vst.msk [vmem:[#allocation4 + $0x8] sm:$0xff] %vm35_vm4, %v764_v55  ;;  %1343 = vst.msk [vmem:[#allocation2] sm:$0xff] %vm35_vm4, %v2656_v12  ;;  %407 = vperm.xlu0 %1783, %v2656_v12  }
 0x1be   :  { %v750_v10 = vpop.xlane.xlu1 %749  ;;  %v326_v49 = vpop.xlane.xlu0 %325 }
 0x1bf   :  { %v772_v39 = vadd.f32 %v750_v10, %v708_v5  ;;  %v2667_v17 = vmax.f32 %v2658_v35, %v326_v49 }
 0x1c1   :  { %788 = vst.msk [vmem:[#allocation4 + $0x48] sm:$0xff] %vm35_vm4, %v772_v39  ;;  %1351 = vst.msk [vmem:[#allocation2 + $0x40] sm:$0xff] %vm35_vm4, %v2667_v17  ;;  %447 = vperm.xlu1 %1782, %v2667_v17   ;;  %v2693_v39 = vld [vmem:[#allocation2 + $0x50] sm:$0xff] }
 0x1c2   :  { %v1122_v18 = vpop.xlane.xlu1 %1121  ;;  %v732_v37 = vpop.xlane.xlu0 %731 }
 0x1c3   :  { %v763_v38 = vadd.f32 %v732_v37, %v699_v50  ;;  %v2695_v50 = vld [vmem:[#allocation2 + $0x10] sm:$0xff] }
 0x1c4   :  { %v1088_v6 = vld [vmem:[#allocation4 + $0x8] sm:$0xff]  ;;  %v709_v37 = vld [vmem:[#allocation4 + $0x50] sm:$0xff] }
 0x1c5   :  { %v1152_v0 = vsub.f32 %v1088_v6, %v1122_v18  ;;  %779 = vst.msk [vmem:[#allocation4] sm:$0xff] %vm35_vm4, %v763_v38 }
 0x1c6   :  { %v748_v40 = vpop.xlane.xlu0 %747  ;;  %v316_v28 = vpop.xlane.xlu1 %315 }
 0x1c7   :  { %1168 = vst.msk [vmem:[#allocation4 + $0x8] sm:$0xff] %vm35_vm4, %v1152_v0  ;;  %v771_v20 = vadd.f32 %v748_v40, %v707_v26  ;;  %v2680_v34 = vmax.f32 %v2675_v14, %v316_v28  ;;  %v702_v40 = vld [vmem:[#allocation4 + $0x18] sm:$0xff]  ;;  %v701_v28 = vld [vmem:[#allocation4 + $0x10] sm:$0xff] }
 0x1c9   :  { %787 = vst.msk [vmem:[#allocation4 + $0x40] sm:$0xff] %vm35_vm4, %v771_v20  ;;  %1346 = vst.msk [vmem:[#allocation2 + $0x18] sm:$0xff] %vm35_vm4, %v2680_v34  ;;  %422 = vperm.xlu1 %1782, %v2680_v34  }
 0x1ca   :  { %v1120_v55 = vpop.xlane.xlu0 %1119  ;;  %v332_v5 = vpop.xlane.xlu1 %331 }
 0x1cb   :  { %v2691_v10 = vmax.f32 %v2682_v58, %v332_v5 }
 0x1cc   :  { %v1087_v49 = vld [vmem:[#allocation4] sm:$0xff] }
 0x1cd   :  { %v1151_v18 = vsub.f32 %v1087_v49, %v1120_v55  ;;  %1354 = vst.msk [vmem:[#allocation2 + $0x58] sm:$0xff] %vm35_vm4, %v2691_v10  ;;  %462 = vperm.xlu0 %1783, %v2691_v10  }
 0x1ce   :  { %v330_v38 = vpop.xlane.xlu0 %329  ;;  %v314_v6 = vpop.xlane.xlu1 %313 }
 0x1cf   :  { %1167 = vst.msk [vmem:[#allocation4] sm:$0xff] %vm35_vm4, %v1151_v18  ;;  %v2704_v26 = vmax.f32 %v2693_v39, %v330_v38  ;;  %v2707_v0 = vmax.f32 %v2695_v50, %v314_v6  ;;  %v710_v6 = vld [vmem:[#allocation4 + $0x58] sm:$0xff] }
 0x1d1   :  { %3220 = vst [vmem:[#allocation20_spill] sm:$0xff] %v2704_v26  ;;  %1353 = vst.msk [vmem:[#allocation2 + $0x50] sm:$0xff] %vm35_vm4, %v2704_v26  ;;  %417 = vperm.xlu1 %1782, %v2707_v0  }
 0x1d2   :  { %1345 = vst.msk [vmem:[#allocation2 + $0x10] sm:$0xff] %vm35_vm4, %v2707_v0  ;;  %v738_v5 = vpop.xlane.xlu1 %737  ;;  %v736_v49 = vpop.xlane.xlu0 %735 }
 0x1d3   :  { %v766_v18 = vadd.f32 %v738_v5, %v702_v40  ;;  %v765_v38 = vadd.f32 %v736_v49, %v701_v28  ;;  %v2723_v40 = vld [vmem:[#allocation2 + $0x28] sm:$0xff]  ;;  %v2725_v49 = vld [vmem:[#allocation2 + $0x20] sm:$0xff] }
 0x1d4   :  { %3221 = vst [vmem:[#allocation21_spill] sm:$0xff] %v2725_v49 }
 0x1d5   :  { %782 = vst.msk [vmem:[#allocation4 + $0x18] sm:$0xff] %vm35_vm4, %v766_v18  ;;  %781 = vst.msk [vmem:[#allocation4 + $0x10] sm:$0xff] %vm35_vm4, %v765_v38  ;;  %457 = vperm.xlu1 %1782, %v2704_v26  }
 0x1d6   :  { %v754_v20 = vpop.xlane.xlu1 %753  ;;  %v752_v23 = vpop.xlane.xlu0 %751 }
 0x1d7   :  { %v774_v55 = vadd.f32 %v754_v20, %v710_v6  ;;  %v773_v24 = vadd.f32 %v752_v23, %v709_v37  ;;  %v2735_v37 = vld [vmem:[#allocation2 + $0x68] sm:$0xff]  ;;  %v2737_v20 = vld [vmem:[#allocation2 + $0x60] sm:$0xff] }
 0x1d8   :  { %3224 = vst [vmem:[#allocation24_spill] sm:$0xff] %v2735_v37  ;;  %3225 = vst [vmem:[#allocation25_spill] sm:$0xff] %v2737_v20 }
 0x1d9   :  { %790 = vst.msk [vmem:[#allocation4 + $0x58] sm:$0xff] %vm35_vm4, %v774_v55  ;;  %789 = vst.msk [vmem:[#allocation4 + $0x50] sm:$0xff] %vm35_vm4, %v773_v24 }
 0x1da   :  { %v1126_v9 = vpop.xlane.xlu1 %1125  ;;  %v1124_v22 = vpop.xlane.xlu0 %1123 }
 0x1dc   :  { %v1090_v28 = vld [vmem:[#allocation4 + $0x18] sm:$0xff]  ;;  %v1089_v5 = vld [vmem:[#allocation4 + $0x10] sm:$0xff] }
 0x1dd   :  { %v1154_v18 = vsub.f32 %v1090_v28, %v1126_v9  ;;  %v1153_v38 = vsub.f32 %v1089_v5, %v1124_v22  ;;  %v712_v28 = vld [vmem:[#allocation4 + $0x68] sm:$0xff] }
 0x1de   :  { %v320_v61 = vpop.xlane.xlu1 %319  ;;  %v318_v26 = vpop.xlane.xlu0 %317 }
 0x1df   :  { %1170 = vst.msk [vmem:[#allocation4 + $0x18] sm:$0xff] %vm35_vm4, %v1154_v18  ;;  %1169 = vst.msk [vmem:[#allocation4 + $0x10] sm:$0xff] %vm35_vm4, %v1153_v38  ;;  %v2730_v23 = vmax.f32 %v2723_v40, %v320_v61  ;;  %v2733_v24 = vmax.f32 %v2725_v49, %v318_v26  ;;  %v704_v18 = vld [vmem:[#allocation4 + $0x28] sm:$0xff]  ;;  %v703_v38 = vld [vmem:[#allocation4 + $0x20] sm:$0xff] }
 0x1e1   :  { %3222 = vst [vmem:[#allocation22_spill] sm:$0xff] %v2730_v23  ;;  %3223 = vst [vmem:[#allocation23_spill] sm:$0xff] %v2733_v24  ;;  %432 = vperm.xlu1 %1782, %v2730_v23  }
 0x1e2   :  { %1348 = vst.msk [vmem:[#allocation2 + $0x28] sm:$0xff] %vm35_vm4, %v2730_v23  ;;  %1347 = vst.msk [vmem:[#allocation2 + $0x20] sm:$0xff] %vm35_vm4, %v2733_v24  ;;  %v336_v61 = vpop.xlane.xlu1 %335  ;;  %v334_v26 = vpop.xlane.xlu0 %333  ;;  %v2767_v23 = vld [vmem:[#allocation2 + $0x38] sm:$0xff] }
 0x1e3   :  { %v2749_v55 = vmax.f32 %v2735_v37, %v336_v61  ;;  %v2752_v6 = vmax.f32 %v2737_v20, %v334_v26  ;;  %v711_v37 = vld [vmem:[#allocation4 + $0x60] sm:$0xff] }
 0x1e5   :  { %3226 = vst [vmem:[#allocation26_spill] sm:$0xff] %v2752_v6  ;;  %1356 = vst.msk [vmem:[#allocation2 + $0x68] sm:$0xff] %vm35_vm4, %v2749_v55  ;;  %427 = vperm.xlu1 %1782, %v2733_v24   ;;  %472 = vperm.xlu0 %1783, %v2749_v55  }
 0x1e6   :  { %1355 = vst.msk [vmem:[#allocation2 + $0x60] sm:$0xff] %vm35_vm4, %v2752_v6  ;;  %v742_v61 = vpop.xlane.xlu1 %741  ;;  %v740_v26 = vpop.xlane.xlu0 %739 }
 0x1e7   :  { %v768_v22 = vadd.f32 %v742_v61, %v704_v18  ;;  %v767_v9 = vadd.f32 %v740_v26, %v703_v38  ;;  %v2774_v26 = vld [vmem:[#allocation2 + $0x78] sm:$0xff] }
 0x1e8   :  { %3228 = vst [vmem:[#allocation28_spill] sm:$0xff] %v2774_v26 }
 0x1e9   :  { %467 = vperm.xlu1 %1782, %v2752_v6   ;;  %784 = vst.msk [vmem:[#allocation4 + $0x28] sm:$0xff] %vm35_vm4, %v768_v22  ;;  %783 = vst.msk [vmem:[#allocation4 + $0x20] sm:$0xff] %vm35_vm4, %v767_v9  ;;  %v2776_v22 = vld [vmem:[#allocation2 + $0x30] sm:$0xff] }
 0x1ea   :  { %v758_v5 = vpop.xlane.xlu1 %757  ;;  %v756_v20 = vpop.xlane.xlu0 %755  ;;  %3229 = vst [vmem:[#allocation29_spill] sm:$0xff] %v2776_v22  ;;  %v2790_v6 = vld [vmem:[#allocation2 + $0x70] sm:$0xff] }
 0x1eb   :  { %v776_v49 = vadd.f32 %v758_v5, %v712_v28  ;;  %v775_v24 = vadd.f32 %v756_v20, %v711_v37  ;;  %3232 = vst [vmem:[#allocation32_spill] sm:$0xff] %v2790_v6  ;;  %v714_v28 = vld [vmem:[#allocation4 + $0x78] sm:$0xff] }
 0x1ed   :  { %792 = vst.msk [vmem:[#allocation4 + $0x68] sm:$0xff] %vm35_vm4, %v776_v49  ;;  %791 = vst.msk [vmem:[#allocation4 + $0x60] sm:$0xff] %vm35_vm4, %v775_v24 }
 0x1ee   :  { %v1128_v18 = vpop.xlane.xlu0 %1127  ;;  %v324_v38 = vpop.xlane.xlu1 %323 }
 0x1ef   :  { %v2772_v61 = vmax.f32 %v2767_v23, %v324_v38  ;;  %v706_v38 = vld [vmem:[#allocation4 + $0x38] sm:$0xff] }
 0x1f0   :  { %v1091_v9 = vld [vmem:[#allocation4 + $0x20] sm:$0xff] }
 0x1f1   :  { %3227 = vst [vmem:[#allocation27_spill] sm:$0xff] %v2772_v61  ;;  %1350 = vst.msk [vmem:[#allocation2 + $0x38] sm:$0xff] %vm35_vm4, %v2772_v61  ;;  %442 = vperm.xlu1 %1782, %v2772_v61   ;;  %v1155_v49 = vsub.f32 %v1091_v9, %v1128_v18 }
 0x1f2   :  { %v340_v24 = vpop.xlane.xlu1 %339  ;;  %v322_v37 = vpop.xlane.xlu0 %321 }
 0x1f3   :  { %v2784_v20 = vmax.f32 %v2774_v26, %v340_v24  ;;  %v2787_v5 = vmax.f32 %v2776_v22, %v322_v37  ;;  %1171 = vst.msk [vmem:[#allocation4 + $0x20] sm:$0xff] %vm35_vm4, %v1155_v49  ;;  %v705_v26 = vld [vmem:[#allocation4 + $0x30] sm:$0xff] }
 0x1f5   :  { %3230 = vst [vmem:[#allocation30_spill] sm:$0xff] %v2784_v20  ;;  %3231 = vst [vmem:[#allocation31_spill] sm:$0xff] %v2787_v5  ;;  %437 = vperm.xlu1 %1782, %v2787_v5   ;;  %482 = vperm.xlu0 %1783, %v2784_v20  }
 0x1f6   :  { %1358 = vst.msk [vmem:[#allocation2 + $0x78] sm:$0xff] %vm35_vm4, %v2784_v20  ;;  %1349 = vst.msk [vmem:[#allocation2 + $0x30] sm:$0xff] %vm35_vm4, %v2787_v5  ;;  %v746_v9 = vpop.xlane.xlu1 %745  ;;  %v338_v49 = vpop.xlane.xlu0 %337 }
 0x1f7   :  { %v770_v24 = vadd.f32 %v746_v9, %v706_v38  ;;  %v2803_v37 = vmax.f32 %v2790_v6, %v338_v49  ;;  %v713_v38 = vld [vmem:[#allocation4 + $0x70] sm:$0xff] }
 0x1f9   :  { %3233 = vst [vmem:[#allocation33_spill] sm:$0xff] %v2803_v37  ;;  %786 = vst.msk [vmem:[#allocation4 + $0x38] sm:$0xff] %vm35_vm4, %v770_v24  ;;  %477 = vperm.xlu1 %1782, %v2803_v37   ;;  %v1108_v24 = vmul.f32 %v2538_v52, %v2396_v25 }
 0x1fa   :  { %1357 = vst.msk [vmem:[#allocation2 + $0x70] sm:$0xff] %vm35_vm4, %v2803_v37  ;;  %v762_v5 = vpop.xlane.xlu1 %761  ;;  %v744_v20 = vpop.xlane.xlu0 %743 }
 0x1fb   :  { %v778_v22 = vadd.f32 %v762_v5, %v714_v28  ;;  %v769_v61 = vadd.f32 %v744_v20, %v705_v26 }
 0x1fd   :  { %794 = vst.msk [vmem:[#allocation4 + $0x78] sm:$0xff] %vm35_vm4, %v778_v22  ;;  %785 = vst.msk [vmem:[#allocation4 + $0x30] sm:$0xff] %vm35_vm4, %v769_v61 }
 0x1fe   :  { %v760_v9 = vpop.xlane.xlu0 %759 }
 0x1ff   :  { %v777_v49 = vadd.f32 %v760_v9, %v713_v38 }
 0x201   :  { %793 = vst.msk [vmem:[#allocation4 + $0x70] sm:$0xff] %vm35_vm4, %v777_v49 }
 0x21d   :  { %1129 = vadd.xlane.f32.xlu1 %v1108_v24 }
 0x238   :  { %v453_v18 = vpop.permute.xlu0 %452  ;;  %v413_v6 = vpop.permute.xlu1 %412 }
 0x239   :  { %v494_v37 = vsub.f32 %v2513_v36, %v453_v18  ;;  %v486_v28 = vsub.f32 %v2511_v31, %v413_v6 }
 0x23b   :  { %v519_v26 = vmul.f32 1.442695, %v494_v37  ;;  %v503_v20 = vmul.f32 1.442695, %v486_v28 }
 0x23c   :  { %v408_v5 = vpop.permute.xlu0 %407 }
 0x23d   :  { %1784 = vpow2.f32 %v519_v26  ;;  %v485_v61 = vsub.f32 %v2519_v51, %v408_v5 }
 0x23e   :  { %1786 = vpow2.f32 %v503_v20 }
 0x23f   :  { %v501_v22 = vmul.f32 1.442695, %v485_v61 }
 0x240   :  { %v448_v38 = vpop.permute.xlu1 %447 }
 0x241   :  { %1788 = vpow2.f32 %v501_v22  ;;  %v493_v9 = vsub.f32 %v2516_v43, %v448_v38 }
 0x243   :  { %v517_v25 = vmul.f32 1.442695, %v493_v9 }
 0x245   :  { %1790 = vpow2.f32 %v517_v25 }
 0x247   :  { %v1785_v49 = vpop.eup %1784 }
 0x248   :  { %v1787_v24 = vpop.eup %1786  ;;  %668 = vadd.xlane.f32.xlu1 %v1785_v49  ;;  %v423_v18 = vpop.permute.xlu1 %422 }
 0x249   :  { %v488_v31 = vsub.f32 %v2525_v11, %v423_v18  ;;  %652 = vadd.xlane.f32.xlu0 %v1787_v24  ;;  %v992_v26 = vmul.f32 %v1787_v24, %v2160_v45  ;;  %v1000_v11 = vmul.f32 %v1785_v49, %v2404_v32 }
 0x24b   :  { %v1789_v6 = vpop.eup %1788  ;;  %v507_v37 = vmul.f32 1.442695, %v488_v31 }
 0x24c   :  { %650 = vadd.xlane.f32.xlu1 %v1789_v6  ;;  %v463_v28 = vpop.permute.xlu0 %462  ;;  %v991_v38 = vmul.f32 %v1789_v6, %v2163_v46 }
 0x24d   :  { %1792 = vpow2.f32 %v507_v37  ;;  %v496_v51 = vsub.f32 %v2527_v15, %v463_v28 }
 0x24f   :  { %v1791_v20 = vpop.eup %1790  ;;  %v523_v5 = vmul.f32 1.442695, %v496_v51 }
 0x250   :  { %v418_v61 = vpop.permute.xlu1 %417  ;;  %666 = vadd.xlane.f32.xlu0 %v1791_v20  ;;  %1009 = vadd.xlane.f32.xlu1 %v992_v26  ;;  %v999_v45 = vmul.f32 %v1791_v20, %v2407_v33 }
 0x251   :  { %1794 = vpow2.f32 %v523_v5  ;;  %v487_v22 = vsub.f32 %v2532_v8, %v418_v61 }
 0x253   :  { %v505_v9 = vmul.f32 1.442695, %v487_v22 }
 0x254   :  { %v458_v25 = vpop.permute.xlu1 %457  ;;  %1025 = vadd.xlane.f32.xlu1 %v1000_v11  ;;  %1007 = vadd.xlane.f32.xlu0 %v991_v38 }
 0x255   :  { %1796 = vpow2.f32 %v505_v9  ;;  %v495_v18 = vsub.f32 %v2529_v30, %v458_v25 }
 0x257   :  { %v1793_v24 = vpop.eup %1792  ;;  %v521_v31 = vmul.f32 1.442695, %v495_v18 }
 0x258   :  { %656 = vadd.xlane.f32.xlu1 %v1793_v24  ;;  %1023 = vadd.xlane.f32.xlu0 %v999_v45  ;;  %v994_v32 = vmul.f32 %v1793_v24, %v2192_v56 }
 0x259   :  { %1798 = vpow2.f32 %v521_v31 }
 0x25b   :  { %v1795_v37 = vpop.eup %1794 }
 0x25c   :  { %672 = vadd.xlane.f32.xlu1 %v1795_v37  ;;  %v1002_v6 = vmul.f32 %v1795_v37, %v2428_v44 }
 0x25f   :  { %v1797_v8 = vpop.eup %1796 }
 0x260   :  { %v433_v46 = vpop.permute.xlu1 %432  ;;  %654 = vadd.xlane.f32.xlu0 %v1797_v8  ;;  %1013 = vadd.xlane.f32.xlu1 %v994_v32  ;;  %v993_v56 = vmul.f32 %v1797_v8, %v2195_v57 }
 0x261   :  { %v490_v49 = vsub.f32 %v2538_v52, %v433_v46 }
 0x263   :  { %v1799_v28 = vpop.eup %1798  ;;  %v511_v51 = vmul.f32 1.442695, %v490_v49 }
 0x264   :  { %v428_v33 = vpop.permute.xlu1 %427  ;;  %670 = vadd.xlane.f32.xlu0 %v1799_v28  ;;  %1029 = vadd.xlane.f32.xlu1 %v1002_v6  ;;  %v473_v26 = vpop.permute.xlu0 %472  ;;  %v1001_v52 = vmul.f32 %v1799_v28, %v2431_v47 }
 0x265   :  { %1800 = vpow2.f32 %v511_v51  ;;  %v489_v20 = vsub.f32 %v2545_v2, %v428_v33  ;;  %v498_v5 = vsub.f32 %v2540_v59, %v473_v26 }
 0x267   :  { %v509_v61 = vmul.f32 1.442695, %v489_v20  ;;  %v527_v22 = vmul.f32 1.442695, %v498_v5 }
 0x268   :  { %v468_v11 = vpop.permute.xlu1 %467  ;;  %1011 = vadd.xlane.f32.xlu0 %v993_v56 }
 0x269   :  { %1802 = vpow2.f32 %v509_v61  ;;  %v497_v44 = vsub.f32 %v2542_v7, %v468_v11  ;;  %v3234_v11 = vld [vmem:[#allocation10_spill] sm:$0xff] }
 0x26a   :  { %1804 = vpow2.f32 %v527_v22 }
 0x26b   :  { %v525_v38 = vmul.f32 1.442695, %v497_v44  ;;  %v1110_v44 = vmul.f32 %v2553_v42, %v3234_v11 }
 0x26c   :  { %1027 = vadd.xlane.f32.xlu0 %v1001_v52  ;;  %v3235_v52 = vld [vmem:[#allocation11_spill] sm:$0xff] }
 0x26d   :  { %1806 = vpow2.f32 %v525_v38  ;;  %v1109_v38 = vmul.f32 %v3235_v52, %v2559_v62 }
 0x26f   :  { %v1801_v9 = vpop.eup %1800 }
 0x270   :  { %v443_v25 = vpop.permute.xlu1 %442  ;;  %660 = vadd.xlane.f32.xlu1 %v1801_v9  ;;  %v996_v49 = vmul.f32 %v1801_v9, %v2234_v3  ;;  %v3236_v9 = vld [vmem:[#allocation12_spill] sm:$0xff] }
 0x271   :  { %v492_v2 = vsub.f32 %v2553_v42, %v443_v25  ;;  %v3238_v25 = vld [vmem:[#allocation14_spill] sm:$0xff] }
 0x273   :  { %v1803_v18 = vpop.eup %1802  ;;  %v515_v57 = vmul.f32 1.442695, %v492_v2  ;;  %v1114_v2 = vmul.f32 %v2527_v15, %v3238_v25 }
 0x274   :  { %v1805_v45 = vpop.eup %1804  ;;  %v438_v24 = vpop.permute.xlu1 %437  ;;  %658 = vadd.xlane.f32.xlu0 %v1803_v18  ;;  %v995_v51 = vmul.f32 %v1803_v18, %v2237_v4  ;;  %v3240_v18 = vld [vmem:[#allocation16_spill] sm:$0xff] }
 0x275   :  { %v483_v31 = vpop.permute.xlu0 %482  ;;  %1808 = vpow2.f32 %v515_v57  ;;  %v491_v37 = vsub.f32 %v2559_v62, %v438_v24  ;;  %676 = vadd.xlane.f32.xlu1 %v1805_v45  ;;  %v1004_v26 = vmul.f32 %v1805_v45, %v2450_v53  ;;  %v1116_v57 = vmul.f32 %v2540_v59, %v3240_v18  ;;  %v3242_v45 = vld [vmem:[#allocation18_spill] sm:$0xff] }
 0x276   :  { %v500_v47 = vsub.f32 %v2555_v13, %v483_v31  ;;  %v1118_v24 = vmul.f32 %v2555_v13, %v3242_v45  ;;  %v1092_v31 = vld [vmem:[#allocation4 + $0x28] sm:$0xff]  ;;  %v3244_v59 = vsub.f32 %v2635_v41, %v2641_v60  ;;  %v3247_v41 = vsub.f32 %v2658_v35, %v2667_v17 }
 0x277   :  { %v1807_v32 = vpop.eup %1806  ;;  %v513_v8 = vmul.f32 1.442695, %v491_v37  ;;  %v3248_v35 = vsub.f32 %v2675_v14, %v2680_v34  ;;  %v3249_v14 = vsub.f32 %v2682_v58, %v2691_v10  ;;  %v3250_v10 = vsub.f32 %v2695_v50, %v2707_v0 }
 0x278   :  { %v531_v46 = vmul.f32 1.442695, %v500_v47  ;;  %v478_v6 = vpop.permute.xlu1 %477  ;;  %674 = vadd.xlane.f32.xlu0 %v1807_v32  ;;  %v1003_v20 = vmul.f32 %v1807_v32, %v2453_v54  ;;  %v375_v47 = vmul.f32 1.442695, %v3244_v59  ;;  %v1411_v59 = vld [vmem:[#allocation4 + $0x8] sm:$0xff] }
 0x279   :  { %1810 = vpow2.f32 %v513_v8  ;;  %v499_v28 = vsub.f32 %v2557_v48, %v478_v6  ;;  %1017 = vadd.xlane.f32.xlu1 %v996_v49  ;;  %v379_v17 = vmul.f32 1.442695, %v3248_v35  ;;  %v395_v34 = vmul.f32 1.442695, %v3249_v14  ;;  %v1458_v14 = vld [vmem:[#allocation2] sm:$0xff] }
 0x27a   :  { %1812 = vpow2.f32 %v531_v46 }
 0x27b   :  { %v529_v33 = vmul.f32 1.442695, %v499_v28 }
 0x27c   :  { %1015 = vadd.xlane.f32.xlu0 %v995_v51  ;;  %v2888_v51 = vld [vmem:[#allocation5 + $0x8] sm:$0xff] }
 0x27d   :  { %1814 = vpow2.f32 %v529_v33  ;;  %1033 = vadd.xlane.f32.xlu1 %v1004_v26  ;;  %v1272_v26 = vld [vmem:[#allocation3 + $0x48] sm:$0xff]  ;;  %vm1379_vm8 = vcmp.gt.f32.partialorder %v2888_v51, 0.0 }
 0x27e   :  { %1816 = vpow2.f32 %v375_v47  ;;  %v1395_v52 = vsel %vm1379_vm8, %v2888_v51, 1.0 }
 0x27f   :  { %v1809_v5 = vpop.eup %1808 }
 0x280   :  { %1031 = vadd.xlane.f32.xlu0 %v1003_v20  ;;  %v998_v22 = vmul.f32 %v1809_v5, %v2370_v16  ;;  %v1112_v16 = vmul.f32 %v2513_v36, %v3236_v9  ;;  %v3241_v36 = vld [vmem:[#allocation17_spill] sm:$0xff] }
 0x281   :  { %664 = vadd.xlane.f32.xlu1 %v1809_v5  ;;  %v1115_v62 = vmul.f32 %v3241_v36, %v2542_v7  ;;  %v3245_v7 = vsub.f32 %v2633_v63, %v2638_v21  ;;  %v389_v63 = vmul.f32 1.442695, %v3247_v41 }
 0x283   :  { %v1811_v3 = vpop.eup %1810  ;;  %v391_v13 = vmul.f32 1.442695, %v3245_v7 }
 0x284   :  { %v1813_v56 = vpop.eup %1812  ;;  %662 = vadd.xlane.f32.xlu0 %v1811_v3  ;;  %v997_v4 = vmul.f32 %v1811_v3, %v2375_v19  ;;  %v3237_v19 = vld [vmem:[#allocation13_spill] sm:$0xff]  ;;  %v2893_v3 = vld [vmem:[#allocation5] sm:$0xff] }
 0x285   :  { %680 = vadd.xlane.f32.xlu1 %v1813_v56  ;;  %v1006_v53 = vmul.f32 %v1813_v56, %v2470_v1  ;;  %v1111_v1 = vmul.f32 %v3237_v19, %v2516_v43  ;;  %v3243_v43 = vld [vmem:[#allocation19_spill] sm:$0xff]  ;;  %1818 = vpow2.f32 %v391_v13  ;;  %v1263_v56 = vld [vmem:[#allocation3] sm:$0xff]  ;;  %vm1378_vm5 = vcmp.gt.f32.partialorder %v2893_v3, 0.0 }
 0x286   :  { %v1117_v15 = vmul.f32 %v3243_v43, %v2557_v48  ;;  %v3246_v48 = vsub.f32 %v2643_v29, %v2656_v12  ;;  %v1264_v12 = vld [vmem:[#allocation3 + $0x8] sm:$0xff]  ;;  %v1394_v58 = vsel %vm1378_vm5, %v2893_v3, 1.0  ;;  %v1266_v43 = vld [vmem:[#allocation3 + $0x18] sm:$0xff] }
 0x287   :  { %v1815_v61 = vpop.eup %1814 }
 0x288   :  { %678 = vadd.xlane.f32.xlu0 %v1815_v61  ;;  %v1005_v54 = vmul.f32 %v1815_v61, %v2473_v27  ;;  %v3239_v27 = vld [vmem:[#allocation15_spill] sm:$0xff]  ;;  %v373_v46 = vmul.f32 1.442695, %v3246_v48  ;;  %v1817_v29 = vpop.eup %1816 }
 0x289   :  { %1021 = vadd.xlane.f32.xlu1 %v998_v22  ;;  %v1113_v42 = vmul.f32 %v3239_v27, %v2529_v30  ;;  %v1280_v20 = vmul.f32 %v1817_v29, %v1264_v12  ;;  %v1265_v12 = vld [vmem:[#allocation3 + $0x10] sm:$0xff] }
 0x28a   :  { %1820 = vpow2.f32 %v373_v46 }
 0x28b   :  { %1822 = vpow2.f32 %v389_v63  ;;  %v2927_v63 = vld [vmem:[#allocation5 + $0x10] sm:$0xff] }
 0x28c   :  { %1019 = vadd.xlane.f32.xlu0 %v997_v4  ;;  %1824 = vpow2.f32 %v379_v17  ;;  %v1459_v17 = vld [vmem:[#allocation2 + $0x8] sm:$0xff]  ;;  %vm1380_vm7 = vcmp.gt.f32.partialorder %v2927_v63, 0.0 }
 0x28d   :  { %1037 = vadd.xlane.f32.xlu1 %v1006_v53  ;;  %1826 = vpow2.f32 %v395_v34  ;;  %v1273_v34 = vld [vmem:[#allocation3 + $0x50] sm:$0xff] }
 0x28e   :  { %1828 = vrcp.f32 %v1395_v52 }
 0x28f   :  { %v1819_v33 = vpop.eup %1818  ;;  %1830 = vrcp.f32 %v1394_v58 }
 0x290   :  { %1035 = vadd.xlane.f32.xlu0 %v1005_v54  ;;  %v1288_v54 = vmul.f32 %v1819_v33, %v1272_v26 }
 0x291   :  { %1133 = vadd.xlane.f32.xlu1 %v1110_v44 }
 0x294   :  { %1131 = vadd.xlane.f32.xlu0 %v1109_v38  ;;  %v1821_v5 = vpop.eup %1820  ;;  %v1271_v38 = vld [vmem:[#allocation3 + $0x40] sm:$0xff] }
 0x295   :  { %1137 = vadd.xlane.f32.xlu1 %v1112_v16  ;;  %v1279_v11 = vmul.f32 %v1821_v5, %v1263_v56  ;;  %v1823_v44 = vpop.eup %1822  ;;  %v3253_v5 = vld [vmem:[#allocation22_spill] sm:$0xff] }
 0x296   :  { %v1287_v27 = vmul.f32 %v1823_v44, %v1271_v38  ;;  %v3254_v56 = vsub.f32 %v2723_v40, %v3253_v5  ;;  %v1396_v38 = vsel %vm1380_vm7, %v2927_v63, 1.0  ;;  %v3255_v40 = vld [vmem:[#allocation21_spill] sm:$0xff] }
 0x298   :  { %1135 = vadd.xlane.f32.xlu0 %v1111_v1 }
 0x299   :  { %1141 = vadd.xlane.f32.xlu1 %v1114_v2  ;;  %v377_v2 = vmul.f32 1.442695, %v3250_v10 }
 0x29b   :  { %1832 = vpow2.f32 %v377_v2 }
 0x29c   :  { %1139 = vadd.xlane.f32.xlu0 %v1113_v42 }
 0x29d   :  { %1145 = vadd.xlane.f32.xlu1 %v1116_v57 }
 0x2a0   :  { %1143 = vadd.xlane.f32.xlu0 %v1115_v62  ;;  %v3251_v62 = vld [vmem:[#allocation20_spill] sm:$0xff] }
 0x2a1   :  { %1149 = vadd.xlane.f32.xlu1 %v1118_v24  ;;  %v3252_v45 = vsub.f32 %v2693_v39, %v3251_v62  ;;  %v1825_v24 = vpop.eup %1824 }
 0x2a2   :  { %v1282_v39 = vmul.f32 %v1825_v24, %v1266_v43  ;;  %v1827_v47 = vpop.eup %1826  ;;  %v3261_v43 = vld [vmem:[#allocation26_spill] sm:$0xff] }
 0x2a3   :  { %v393_v50 = vmul.f32 1.442695, %v3252_v45 }
 0x2a4   :  { %1147 = vadd.xlane.f32.xlu0 %v1117_v15 }
 0x2aa   :  { %v1130_v37 = vpop.xlane.xlu1 %1129 }
 0x2ab   :  { %v1156_v30 = vsub.f32 %v1092_v31, %v1130_v37  ;;  %v2923_v37 = vld [vmem:[#allocation5 + $0x18] sm:$0xff] }
 0x2ac   :  { %vm1381_vm6 = vcmp.gt.f32.partialorder %v2923_v37, 0.0 }
 0x2ad   :  { %1172 = vst.msk [vmem:[#allocation4 + $0x28] sm:$0xff] %vm35_vm4, %v1156_v30  ;;  %v1397_v29 = vsel %vm1381_vm6, %v2923_v37, 1.0 }
 0x2d5   :  { %v669_v32 = vpop.xlane.xlu1 %668 }
 0x2d6   :  { %692 = vst.msk [vmem:[#allocation6 + $0x48] sm:$0xff] %vm35_vm4, %v669_v32  ;;  %v653_v8 = vpop.xlane.xlu0 %652  ;;  %v1274_v32 = vld [vmem:[#allocation3 + $0x58] sm:$0xff] }
 0x2d7   :  { %684 = vst.msk [vmem:[#allocation6 + $0x8] sm:$0xff] %vm35_vm4, %v653_v8  ;;  %v1829_v8 = vpop.eup %1828 }
 0x2d8   :  { %v1429_v46 = vmul.f32 %v1829_v8, %v1411_v59  ;;  %v1831_v41 = vpop.eup %1830 }
 0x2d9   :  { %v651_v49 = vpop.xlane.xlu1 %650 }
 0x2da   :  { %683 = vst.msk [vmem:[#allocation6] sm:$0xff] %vm35_vm4, %v651_v49  ;;  %v1410_v49 = vld [vmem:[#allocation4] sm:$0xff] }
 0x2db   :  { %v1427_v33 = vmul.f32 %v1831_v41, %v1410_v49  ;;  %v1268_v49 = vld [vmem:[#allocation3 + $0x28] sm:$0xff] }
 0x2dd   :  { %v1010_v21 = vpop.xlane.xlu1 %1009  ;;  %v667_v60 = vpop.xlane.xlu0 %666 }
 0x2de   :  { %1040 = vst.msk [vmem:[#allocation6 + $0x8] sm:$0xff] %vm35_vm4, %v1010_v21  ;;  %691 = vst.msk [vmem:[#allocation6 + $0x40] sm:$0xff] %vm35_vm4, %v667_v60  ;;  %v1290_v21 = vmul.f32 %v1827_v47, %v1274_v32  ;;  %v1833_v60 = vpop.eup %1832 }
 0x2e1   :  { %v1026_v6 = vpop.xlane.xlu1 %1025  ;;  %v1008_v28 = vpop.xlane.xlu0 %1007 }
 0x2e2   :  { %1048 = vst.msk [vmem:[#allocation6 + $0x48] sm:$0xff] %vm35_vm4, %v1026_v6  ;;  %1039 = vst.msk [vmem:[#allocation6] sm:$0xff] %vm35_vm4, %v1008_v28 }
 0x2e5   :  { %v1296_v61 = vld [vmem:[#allocation6 + $0x8] sm:$0xff]  ;;  %v657_v22 = vpop.xlane.xlu1 %656  ;;  %v1024_v4 = vpop.xlane.xlu0 %1023 }
 0x2e6   :  { %v1312_v53 = vadd.f32 %v1296_v61, %v1280_v20  ;;  %686 = vst.msk [vmem:[#allocation6 + $0x18] sm:$0xff] %vm35_vm4, %v657_v22  ;;  %1047 = vst.msk [vmem:[#allocation6 + $0x40] sm:$0xff] %vm35_vm4, %v1024_v4  ;;  %v1475_v20 = vsub.f32 %v1429_v46, %v1459_v17  ;;  %v383_v61 = vmul.f32 1.442695, %v3254_v56  ;;  %v1281_v4 = vmul.f32 %v1833_v60, %v1265_v12  ;;  %v1461_v46 = vld [vmem:[#allocation2 + $0x18] sm:$0xff]  ;;  %v1412_v60 = vld [vmem:[#allocation4 + $0x10] sm:$0xff] }
 0x2e8   :  { %1328 = vst.msk [vmem:[#allocation3 + $0x8] sm:$0xff] %vm35_vm4, %v1312_v53 }
 0x2e9   :  { %v1304_v9 = vld [vmem:[#allocation6 + $0x48] sm:$0xff]  ;;  %v1295_v16 = vld [vmem:[#allocation6] sm:$0xff]  ;;  %v673_v19 = vpop.xlane.xlu1 %672 }
 0x2ea   :  { %v1320_v1 = vadd.f32 %v1304_v9, %v1288_v54  ;;  %v1311_v25 = vadd.f32 %v1295_v16, %v1279_v11  ;;  %694 = vst.msk [vmem:[#allocation6 + $0x58] sm:$0xff] %vm35_vm4, %v673_v19  ;;  %v1474_v9 = vsub.f32 %v1427_v33, %v1458_v14  ;;  %v3256_v19 = vld [vmem:[#allocation23_spill] sm:$0xff] }
 0x2ec   :  { %1336 = vst.msk [vmem:[#allocation3 + $0x48] sm:$0xff] %vm35_vm4, %v1320_v1  ;;  %1327 = vst.msk [vmem:[#allocation3] sm:$0xff] %vm35_vm4, %v1311_v25  ;;  %v3257_v1 = vsub.f32 %v3255_v40, %v3256_v19  ;;  %v3269_v40 = vld [vmem:[#allocation30_spill] sm:$0xff] }
 0x2ed   :  { %v1303_v42 = vld [vmem:[#allocation6 + $0x40] sm:$0xff]  ;;  %v1014_v18 = vpop.xlane.xlu1 %1013  ;;  %v655_v57 = vpop.xlane.xlu0 %654 }
 0x2ee   :  { %v1319_v36 = vadd.f32 %v1303_v42, %v1287_v27  ;;  %1042 = vst.msk [vmem:[#allocation6 + $0x18] sm:$0xff] %vm35_vm4, %v1014_v18  ;;  %685 = vst.msk [vmem:[#allocation6 + $0x10] sm:$0xff] %vm35_vm4, %v655_v57  ;;  %v381_v25 = vmul.f32 1.442695, %v3257_v1  ;;  %v3258_v42 = vld [vmem:[#allocation24_spill] sm:$0xff] }
 0x2ef   :  { %v1491_v0 = vld [vmem:[#allocation3 + $0x8] sm:$0xff]  ;;  %v3259_v18 = vsub.f32 %v3258_v42, %v2749_v55  ;;  %v3260_v55 = vld [vmem:[#allocation25_spill] sm:$0xff] }
 0x2f0   :  { %1834 = vlog2.f32 %v1491_v0  ;;  %1335 = vst.msk [vmem:[#allocation3 + $0x40] sm:$0xff] %vm35_vm4, %v1319_v36 }
 0x2f1   :  { %v1030_v15 = vpop.xlane.xlu1 %1029  ;;  %v671_v31 = vpop.xlane.xlu0 %670  ;;  %1836 = vpow2.f32 %v393_v50  ;;  %v399_v57 = vmul.f32 1.442695, %v3259_v18 }
 0x2f2   :  { %1050 = vst.msk [vmem:[#allocation6 + $0x58] sm:$0xff] %vm35_vm4, %v1030_v15  ;;  %693 = vst.msk [vmem:[#allocation6 + $0x50] sm:$0xff] %vm35_vm4, %v671_v31  ;;  %v3262_v15 = vsub.f32 %v3260_v55, %v3261_v43 }
 0x2f3   :  { %v1490_v30 = vld [vmem:[#allocation3] sm:$0xff] }
 0x2f4   :  { %1838 = vlog2.f32 %v1490_v30  ;;  %v397_v31 = vmul.f32 1.442695, %v3262_v15  ;;  %v1413_v30 = vld [vmem:[#allocation4 + $0x18] sm:$0xff] }
 0x2f5   :  { %v1298_v7 = vld [vmem:[#allocation6 + $0x18] sm:$0xff]  ;;  %v1012_v13 = vpop.xlane.xlu0 %1011  ;;  %1840 = vrcp.f32 %v1397_v29 }
 0x2f6   :  { %v1314_v48 = vadd.f32 %v1298_v7, %v1282_v39  ;;  %1041 = vst.msk [vmem:[#allocation6 + $0x10] sm:$0xff] %vm35_vm4, %v1012_v13  ;;  %1842 = vpow2.f32 %v383_v61 }
 0x2f8   :  { %1330 = vst.msk [vmem:[#allocation3 + $0x18] sm:$0xff] %vm35_vm4, %v1314_v48 }
 0x2f9   :  { %v1306_v6 = vld [vmem:[#allocation6 + $0x58] sm:$0xff]  ;;  %v1028_v28 = vpop.xlane.xlu0 %1027 }
 0x2fa   :  { %v1835_v35 = vpop.eup %1834  ;;  %v1322_v26 = vadd.f32 %v1306_v6, %v1290_v21  ;;  %1049 = vst.msk [vmem:[#allocation6 + $0x50] sm:$0xff] %vm35_vm4, %v1028_v28  ;;  %v2972_v6 = vld [vmem:[#allocation5 + $0x28] sm:$0xff] }
 0x2fb   :  { %v1509_v22 = vmul.f32 0.6931472, %v1835_v35  ;;  %v1837_v53 = vpop.eup %1836  ;;  %v3263_v28 = vld [vmem:[#allocation27_spill] sm:$0xff]  ;;  %vm1383_vm9 = vcmp.gt.f32.partialorder %v2972_v6, 0.0 }
 0x2fc   :  { %1338 = vst.msk [vmem:[#allocation3 + $0x58] sm:$0xff] %vm35_vm4, %v1322_v26  ;;  %v1289_v27 = vmul.f32 %v1837_v53, %v1273_v34  ;;  %v3264_v35 = vsub.f32 %v2767_v23, %v3263_v28  ;;  %v2978_v34 = vld [vmem:[#allocation5 + $0x20] sm:$0xff]  ;;  %v3031_v28 = vld [vmem:[#allocation5 + $0x58] sm:$0xff] }
 0x2fd   :  { %v1539_v54 = vsub.f32 %v1475_v20, %v1509_v22  ;;  %v1297_v11 = vld [vmem:[#allocation6 + $0x10] sm:$0xff]  ;;  %v661_v44 = vpop.xlane.xlu1 %660  ;;  %v1267_v20 = vld [vmem:[#allocation3 + $0x20] sm:$0xff]  ;;  %vm1382_vm10 = vcmp.gt.f32.partialorder %v2978_v34, 0.0  ;;  %vm1389_vm0 = vcmp.gt.f32.partialorder %v3031_v28, 0.0 }
 0x2fe   :  { %v1839_v52 = vpop.eup %1838  ;;  %v1313_v16 = vadd.f32 %v1297_v11, %v1281_v4  ;;  %688 = vst.msk [vmem:[#allocation6 + $0x28] sm:$0xff] %vm35_vm4, %v661_v44  ;;  %v387_v17 = vmul.f32 1.442695, %v3264_v35  ;;  %v1276_v4 = vld [vmem:[#allocation3 + $0x68] sm:$0xff]  ;;  %v1270_v35 = vld [vmem:[#allocation3 + $0x38] sm:$0xff] }
 0x2ff   :  { %v1555_v58 = vmul.f32 -1.0, %v1539_v54  ;;  %v1507_v10 = vmul.f32 0.6931472, %v1839_v52  ;;  %v1493_v2 = vld [vmem:[#allocation3 + $0x18] sm:$0xff]  ;;  %v1841_v47 = vpop.eup %1840  ;;  %v3266_v11 = vld [vmem:[#allocation31_spill] sm:$0xff] }
 0x300   :  { %1844 = vlog2.f32 %v1493_v2  ;;  %1329 = vst.msk [vmem:[#allocation3 + $0x10] sm:$0xff] %vm35_vm4, %v1313_v16  ;;  %v1433_v7 = vmul.f32 %v1841_v47, %v1413_v30  ;;  %v1843_v8 = vpop.eup %1842  ;;  %v3265_v54 = vld [vmem:[#allocation29_spill] sm:$0xff]  ;;  %v3268_v16 = vld [vmem:[#allocation28_spill] sm:$0xff]  ;;  %v1275_v2 = vld [vmem:[#allocation3 + $0x60] sm:$0xff] }
 0x301   :  { %v1571_v36 = vsel %vm1379_vm8, %v1555_v58, 0.0  ;;  %v1538_v62 = vsub.f32 %v1474_v9, %v1507_v10  ;;  %v1305_v45 = vld [vmem:[#allocation6 + $0x50] sm:$0xff]  ;;  %v659_v50 = vpop.xlane.xlu0 %658  ;;  %1846 = vrcp.f32 %v1396_v38  ;;  %v1284_v26 = vmul.f32 %v1843_v8, %v1268_v49 }
 0x302   :  { %1587 = vst.msk [vmem:[%s3177_s4 + $0x8] sm:$0xff] %vm35_vm4, %v1571_v36  ;;  %v1321_v0 = vadd.f32 %v1305_v45, %v1289_v27  ;;  %v677_v24 = vpop.xlane.xlu1 %676  ;;  %687 = vst.msk [vmem:[#allocation6 + $0x20] sm:$0xff] %vm35_vm4, %v659_v50  ;;  %1848 = vpow2.f32 %v381_v25  ;;  %v1477_v21 = vsub.f32 %v1433_v7, %v1461_v46  ;;  %v3267_v23 = vsub.f32 %v3265_v54, %v3266_v11  ;;  %v1460_v58 = vld [vmem:[#allocation2 + $0x10] sm:$0xff]  ;;  %v1278_v11 = vld [vmem:[#allocation3 + $0x78] sm:$0xff] }
 0x303   :  { %v1554_v51 = vmul.f32 -1.0, %v1538_v62  ;;  %696 = vst.msk [vmem:[#allocation6 + $0x68] sm:$0xff] %vm35_vm4, %v677_v24  ;;  %1850 = vpow2.f32 %v399_v57  ;;  %v3270_v19 = vsub.f32 %v3268_v16, %v3269_v40  ;;  %v1399_v36 = vsel %vm1383_vm9, %v2972_v6, 1.0  ;;  %v3272_v24 = vld [vmem:[#allocation33_spill] sm:$0xff]  ;;  %v3021_v49 = vld [vmem:[#allocation5 + $0x50] sm:$0xff]  ;;  %v1499_v40 = vld [vmem:[#allocation3 + $0x48] sm:$0xff] }
 0x304   :  { %1337 = vst.msk [vmem:[#allocation3 + $0x50] sm:$0xff] %vm35_vm4, %v1321_v0  ;;  %1852 = vpow2.f32 %v397_v31  ;;  %v385_v44 = vmul.f32 1.442695, %v3267_v23  ;;  %v3271_v0 = vld [vmem:[#allocation32_spill] sm:$0xff]  ;;  %vm1388_vm15 = vcmp.gt.f32.partialorder %v3021_v49, 0.0 }
 0x305   :  { %v1570_v59 = vsel %vm1378_vm5, %v1554_v51, 0.0  ;;  %v675_v39 = vpop.xlane.xlu0 %674  ;;  %v403_v1 = vmul.f32 1.442695, %v3270_v19  ;;  %v3273_v55 = vsub.f32 %v3271_v0, %v3272_v24  ;;  %v3004_v51 = vld [vmem:[#allocation5 + $0x30] sm:$0xff]  ;;  %v1404_v54 = vsel %vm1388_vm15, %v3021_v49, 1.0  ;;  %v1096_v24 = vld [vmem:[#allocation4 + $0x48] sm:$0xff] }
 0x306   :  { %1586 = vst.msk [vmem:[%s3177_s4] sm:$0xff] %vm35_vm4, %v1570_v59  ;;  %v1018_v32 = vpop.xlane.xlu1 %1017  ;;  %695 = vst.msk [vmem:[#allocation6 + $0x60] sm:$0xff] %vm35_vm4, %v675_v39  ;;  %v1398_v59 = vsel %vm1382_vm10, %v2978_v34, 1.0  ;;  %v3010_v39 = vld [vmem:[#allocation5 + $0x38] sm:$0xff]  ;;  %vm1384_vm11 = vcmp.gt.f32.partialorder %v3004_v51, 0.0  ;;  %v1405_v19 = vsel %vm1389_vm0, %v3031_v28, 1.0 }
 0x307   :  { %v1492_v13 = vld [vmem:[#allocation3 + $0x10] sm:$0xff]  ;;  %1044 = vst.msk [vmem:[#allocation6 + $0x28] sm:$0xff] %vm35_vm4, %v1018_v32  ;;  %v401_v43 = vmul.f32 1.442695, %v3273_v55  ;;  %vm1385_vm12 = vcmp.gt.f32.partialorder %v3010_v39, 0.0 }
 0x308   :  { %1854 = vlog2.f32 %v1492_v13  ;;  %v3013_v13 = vld [vmem:[#allocation5 + $0x40] sm:$0xff]  ;;  %v1401_v63 = vsel %vm1385_vm12, %v3010_v39, 1.0 }
 0x309   :  { %v1016_v48 = vpop.xlane.xlu0 %1015  ;;  %1856 = vpow2.f32 %v387_v17  ;;  %vm1386_vm13 = vcmp.gt.f32.partialorder %v3013_v13, 0.0 }
 0x30a   :  { %v1845_v3 = vpop.eup %1844  ;;  %v1034_v41 = vpop.xlane.xlu1 %1033  ;;  %1043 = vst.msk [vmem:[#allocation6 + $0x20] sm:$0xff] %vm35_vm4, %v1016_v48  ;;  %1858 = vpow2.f32 %v385_v44  ;;  %v1094_v44 = vld [vmem:[#allocation4 + $0x38] sm:$0xff] }
 0x30b   :  { %v1513_v29 = vmul.f32 0.6931472, %v1845_v3  ;;  %1052 = vst.msk [vmem:[#allocation6 + $0x68] sm:$0xff] %vm35_vm4, %v1034_v41  ;;  %v1847_v12 = vpop.eup %1846  ;;  %1860 = vpow2.f32 %v403_v1  ;;  %v3017_v3 = vld [vmem:[#allocation5 + $0x48] sm:$0xff]  ;;  %v3060_v1 = vld [vmem:[#allocation5 + $0x60] sm:$0xff] }
 0x30c   :  { %v1849_v33 = vpop.eup %1848  ;;  %v1431_v22 = vmul.f32 %v1847_v12, %v1412_v60  ;;  %1862 = vrcp.f32 %v1399_v36  ;;  %v1400_v12 = vsel %vm1384_vm11, %v3004_v51, 1.0  ;;  %vm1387_vm14 = vcmp.gt.f32.partialorder %v3017_v3, 0.0 }
 0x30d   :  { %v1541_v5 = vsub.f32 %v1477_v21, %v1513_v29  ;;  %v1032_v56 = vpop.xlane.xlu0 %1031  ;;  %v1851_v61 = vpop.eup %1850  ;;  %v1283_v9 = vmul.f32 %v1849_v33, %v1267_v20  ;;  %1864 = vpow2.f32 %v401_v43  ;;  %v3042_v33 = vld [vmem:[#allocation5 + $0x68] sm:$0xff]  ;;  %v1402_v20 = vsel %vm1386_vm13, %v3013_v13, 1.0 }
 0x30e   :  { %v1300_v53 = vld [vmem:[#allocation6 + $0x28] sm:$0xff]  ;;  %v665_v14 = vpop.xlane.xlu1 %664  ;;  %1051 = vst.msk [vmem:[#allocation6 + $0x60] sm:$0xff] %vm35_vm4, %v1032_v56  ;;  %v1853_v25 = vpop.eup %1852  ;;  %v1292_v10 = vmul.f32 %v1851_v61, %v1276_v4  ;;  %v1476_v62 = vsub.f32 %v1431_v22, %v1460_v58  ;;  %1866 = vrcp.f32 %v1398_v59  ;;  %v1403_v56 = vsel %vm1387_vm14, %v3017_v3, 1.0  ;;  %v1269_v22 = vld [vmem:[#allocation3 + $0x30] sm:$0xff]  ;;  %v1414_v58 = vld [vmem:[#allocation4 + $0x20] sm:$0xff] }
 0x30f   :  { %v1557_v52 = vmul.f32 -1.0, %v1541_v5  ;;  %v1316_v38 = vadd.f32 %v1300_v53, %v1284_v26  ;;  %690 = vst.msk [vmem:[#allocation6 + $0x38] sm:$0xff] %vm35_vm4, %v665_v14  ;;  %v1291_v30 = vmul.f32 %v1853_v25, %v1275_v2  ;;  %v1415_v4 = vld [vmem:[#allocation4 + $0x28] sm:$0xff]  ;;  %vm1391_vm1 = vcmp.gt.f32.partialorder %v3042_v33, 0.0  ;;  %v3062_v25 = vld [vmem:[#allocation5 + $0x78] sm:$0xff] }
 0x310   :  { %vm1390_vm2 = vcmp.gt.f32.partialorder %v3060_v1, 0.0  ;;  %vm1393_vm3 = vcmp.gt.f32.partialorder %v3062_v25, 0.0 }
 0x311   :  { %v1573_v27 = vsel %vm1381_vm6, %v1557_v52, 0.0  ;;  %1332 = vst.msk [vmem:[#allocation3 + $0x28] sm:$0xff] %vm35_vm4, %v1316_v38  ;;  %v1299_v42 = vld [vmem:[#allocation6 + $0x20] sm:$0xff]  ;;  %v663_v18 = vpop.xlane.xlu0 %662 }
 0x312   :  { %v1855_v57 = vpop.eup %1854  ;;  %1589 = vst.msk [vmem:[%s3177_s4 + $0x18] sm:$0xff] %vm35_vm4, %v1573_v27  ;;  %v1308_v45 = vld [vmem:[#allocation6 + $0x68] sm:$0xff]  ;;  %v1315_v37 = vadd.f32 %v1299_v42, %v1283_v9  ;;  %v681_v50 = vpop.xlane.xlu1 %680  ;;  %689 = vst.msk [vmem:[#allocation6 + $0x30] sm:$0xff] %vm35_vm4, %v663_v18  ;;  %v1407_v42 = vsel %vm1391_vm1, %v3042_v33, 1.0 }
 0x313   :  { %v1511_v15 = vmul.f32 0.6931472, %v1855_v57  ;;  %v1324_v31 = vadd.f32 %v1308_v45, %v1292_v10  ;;  %698 = vst.msk [vmem:[#allocation6 + $0x78] sm:$0xff] %vm35_vm4, %v681_v50  ;;  %v1857_v29 = vpop.eup %1856  ;;  %v1277_v57 = vld [vmem:[#allocation3 + $0x70] sm:$0xff] }
 0x314   :  { %1331 = vst.msk [vmem:[#allocation3 + $0x20] sm:$0xff] %vm35_vm4, %v1315_v37  ;;  %v1859_v5 = vpop.eup %1858  ;;  %v1286_v61 = vmul.f32 %v1857_v29, %v1270_v35 }
 0x315   :  { %v1540_v47 = vsub.f32 %v1476_v62, %v1511_v15  ;;  %1340 = vst.msk [vmem:[#allocation3 + $0x68] sm:$0xff] %vm35_vm4, %v1324_v31  ;;  %v1307_v32 = vld [vmem:[#allocation6 + $0x60] sm:$0xff]  ;;  %v679_v7 = vpop.xlane.xlu0 %678  ;;  %v1861_v14 = vpop.eup %1860  ;;  %v1285_v10 = vmul.f32 %v1859_v5, %v1269_v22  ;;  %v1093_v62 = vld [vmem:[#allocation4 + $0x30] sm:$0xff] }
 0x316   :  { %v1323_v8 = vadd.f32 %v1307_v32, %v1291_v30  ;;  %v1022_v48 = vpop.xlane.xlu1 %1021  ;;  %697 = vst.msk [vmem:[#allocation6 + $0x70] sm:$0xff] %vm35_vm4, %v679_v7  ;;  %v1863_v38 = vpop.eup %1862  ;;  %v1294_v18 = vmul.f32 %v1861_v14, %v1278_v11  ;;  %v1498_v15 = vld [vmem:[#allocation3 + $0x40] sm:$0xff]  ;;  %v1463_v30 = vld [vmem:[#allocation2 + $0x28] sm:$0xff]  ;;  %v1501_v7 = vld [vmem:[#allocation3 + $0x58] sm:$0xff]  ;;  %v1406_v11 = vsel %vm1390_vm2, %v3060_v1, 1.0 }
 0x317   :  { %v1556_v46 = vmul.f32 -1.0, %v1540_v47  ;;  %1046 = vst.msk [vmem:[#allocation6 + $0x38] sm:$0xff] %vm35_vm4, %v1022_v48  ;;  %v1437_v2 = vmul.f32 %v1863_v38, %v1415_v4  ;;  %v1865_v27 = vpop.eup %1864  ;;  %v3077_v22 = vld [vmem:[#allocation5 + $0x70] sm:$0xff] }
 0x318   :  { %v1495_v41 = vld [vmem:[#allocation3 + $0x28] sm:$0xff]  ;;  %1339 = vst.msk [vmem:[#allocation3 + $0x60] sm:$0xff] %vm35_vm4, %v1323_v8  ;;  %v1867_v37 = vpop.eup %1866  ;;  %v1293_v8 = vmul.f32 %v1865_v27, %v1277_v57  ;;  %vm1392_vm8 = vcmp.gt.f32.partialorder %v3077_v22, 0.0 }
 0x319   :  { %v1572_v21 = vsel %vm1380_vm7, %v1556_v46, 0.0  ;;  %1868 = vlog2.f32 %v1495_v41  ;;  %v1020_v60 = vpop.xlane.xlu0 %1019  ;;  %v1435_v59 = vmul.f32 %v1867_v37, %v1414_v58  ;;  %v1479_v48 = vsub.f32 %v1437_v2, %v1463_v30  ;;  %v1500_v41 = vld [vmem:[#allocation3 + $0x50] sm:$0xff] }
 0x31a   :  { %1588 = vst.msk [vmem:[%s3177_s4 + $0x10] sm:$0xff] %vm35_vm4, %v1572_v21  ;;  %v1038_v17 = vpop.xlane.xlu1 %1037  ;;  %1045 = vst.msk [vmem:[#allocation6 + $0x30] sm:$0xff] %vm35_vm4, %v1020_v60  ;;  %v1095_v60 = vld [vmem:[#allocation4 + $0x40] sm:$0xff] }
 0x31b   :  { %v1494_v26 = vld [vmem:[#allocation3 + $0x20] sm:$0xff]  ;;  %1054 = vst.msk [vmem:[#allocation6 + $0x78] sm:$0xff] %vm35_vm4, %v1038_v17 }
 0x31c   :  { %1870 = vlog2.f32 %v1494_v26  ;;  %v1462_v17 = vld [vmem:[#allocation2 + $0x20] sm:$0xff] }
 0x31d   :  { %1872 = vrcp.f32 %v1400_v12  ;;  %v1036_v53 = vpop.xlane.xlu0 %1035  ;;  %v1503_v12 = vld [vmem:[#allocation3 + $0x68] sm:$0xff]  ;;  %v1478_v4 = vsub.f32 %v1435_v59, %v1462_v17 }
 0x31e   :  { %1874 = vrcp.f32 %v1401_v63  ;;  %v1302_v23 = vld [vmem:[#allocation6 + $0x38] sm:$0xff]  ;;  %v1134_v52 = vpop.xlane.xlu1 %1133  ;;  %1053 = vst.msk [vmem:[#allocation6 + $0x70] sm:$0xff] %vm35_vm4, %v1036_v53  ;;  %v1467_v59 = vld [vmem:[#allocation2 + $0x48] sm:$0xff] }
 0x31f   :  { %1876 = vrcp.f32 %v1402_v20  ;;  %v1318_v9 = vadd.f32 %v1302_v23, %v1286_v61  ;;  %v1158_v16 = vsub.f32 %v1094_v44, %v1134_v52  ;;  %v1098_v20 = vld [vmem:[#allocation4 + $0x58] sm:$0xff]  ;;  %v1502_v37 = vld [vmem:[#allocation3 + $0x60] sm:$0xff] }
 0x320   :  { %1878 = vrcp.f32 %v1403_v56 }
 0x321   :  { %1880 = vrcp.f32 %v1404_v54  ;;  %1334 = vst.msk [vmem:[#allocation3 + $0x38] sm:$0xff] %vm35_vm4, %v1318_v9  ;;  %v1301_v36 = vld [vmem:[#allocation6 + $0x30] sm:$0xff]  ;;  %1174 = vst.msk [vmem:[#allocation4 + $0x38] sm:$0xff] %vm35_vm4, %v1158_v16  ;;  %v1132_v45 = vpop.xlane.xlu0 %1131 }
 0x322   :  { %v1310_v50 = vld [vmem:[#allocation6 + $0x78] sm:$0xff]  ;;  %v1317_v0 = vadd.f32 %v1301_v36, %v1285_v10  ;;  %1882 = vlog2.f32 %v1499_v40  ;;  %v1138_v55 = vpop.xlane.xlu1 %1137  ;;  %v1157_v43 = vsub.f32 %v1093_v62, %v1132_v45  ;;  %v1097_v9 = vld [vmem:[#allocation4 + $0x50] sm:$0xff]  ;;  %v1100_v10 = vld [vmem:[#allocation4 + $0x68] sm:$0xff] }
 0x323   :  { %v1869_v31 = vpop.eup %1868  ;;  %1884 = vrcp.f32 %v1405_v19  ;;  %v1326_v47 = vadd.f32 %v1310_v50, %v1294_v18  ;;  %v1160_v32 = vsub.f32 %v1096_v24, %v1138_v55  ;;  %v1409_v19 = vsel %vm1393_vm3, %v3062_v25, 1.0 }
 0x324   :  { %1886 = vrcp.f32 %v1407_v42  ;;  %v1517_v46 = vmul.f32 0.6931472, %v1869_v31  ;;  %1333 = vst.msk [vmem:[#allocation3 + $0x30] sm:$0xff] %vm35_vm4, %v1317_v0  ;;  %1173 = vst.msk [vmem:[#allocation4 + $0x30] sm:$0xff] %vm35_vm4, %v1157_v43  ;;  %v1408_v0 = vsel %vm1392_vm8, %v3077_v22, 1.0 }
 0x325   :  { %1342 = vst.msk [vmem:[#allocation3 + $0x78] sm:$0xff] %vm35_vm4, %v1326_v47  ;;  %v1309_v21 = vld [vmem:[#allocation6 + $0x70] sm:$0xff]  ;;  %1176 = vst.msk [vmem:[#allocation4 + $0x48] sm:$0xff] %vm35_vm4, %v1160_v32  ;;  %1888 = vlog2.f32 %v1498_v15  ;;  %v1136_v29 = vpop.xlane.xlu0 %1135  ;;  %v1099_v15 = vld [vmem:[#allocation4 + $0x60] sm:$0xff] }
 0x326   :  { %v1871_v35 = vpop.eup %1870  ;;  %v1543_v63 = vsub.f32 %v1479_v48, %v1517_v46  ;;  %v1325_v26 = vadd.f32 %v1309_v21, %v1293_v8  ;;  %1890 = vlog2.f32 %v1501_v7  ;;  %v1142_v5 = vpop.xlane.xlu1 %1141  ;;  %v1159_v56 = vsub.f32 %v1095_v60, %v1136_v29  ;;  %v1102_v47 = vld [vmem:[#allocation4 + $0x78] sm:$0xff] }
 0x327   :  { %v3075_v61 = vpop.eup %1872  ;;  %v1515_v53 = vmul.f32 0.6931472, %v1871_v35  ;;  %v1162_v14 = vsub.f32 %v1098_v20, %v1142_v5  ;;  %1892 = vlog2.f32 %v1500_v41 }
 0x328   :  { %v1875_v54 = vpop.eup %1874  ;;  %v1559_v23 = vmul.f32 -1.0, %v1543_v63  ;;  %v1497_v44 = vld [vmem:[#allocation3 + $0x38] sm:$0xff]  ;;  %1341 = vst.msk [vmem:[#allocation3 + $0x70] sm:$0xff] %vm35_vm4, %v1325_v26  ;;  %1175 = vst.msk [vmem:[#allocation4 + $0x40] sm:$0xff] %vm35_vm4, %v1159_v56  ;;  %1894 = vlog2.f32 %v1503_v12  ;;  %v1466_v26 = vld [vmem:[#allocation2 + $0x40] sm:$0xff] }
 0x329   :  { %v1877_v52 = vpop.eup %1876  ;;  %v1542_v38 = vsub.f32 %v1478_v4, %v1515_v53  ;;  %1896 = vlog2.f32 %v1497_v44  ;;  %1178 = vst.msk [vmem:[#allocation4 + $0x58] sm:$0xff] %vm35_vm4, %v1162_v14  ;;  %v1140_v16 = vpop.xlane.xlu0 %1139  ;;  %v1417_v55 = vld [vmem:[#allocation4 + $0x38] sm:$0xff]  ;;  %v1101_v56 = vld [vmem:[#allocation4 + $0x70] sm:$0xff] }
 0x32a   :  { %v1879_v40 = vpop.eup %1878  ;;  %v1575_v58 = vsel %vm1383_vm9, %v1559_v23, 0.0  ;;  %v1146_v2 = vpop.xlane.xlu1 %1145  ;;  %v1161_v27 = vsub.f32 %v1097_v9, %v1140_v16  ;;  %1898 = vrcp.f32 %v1406_v11  ;;  %v1441_v29 = vmul.f32 %v1875_v54, %v1417_v55  ;;  %v1469_v14 = vld [vmem:[#allocation2 + $0x58] sm:$0xff] }
 0x32b   :  { %v3091_v42 = vpop.eup %1880  ;;  %1591 = vst.msk [vmem:[%s3177_s4 + $0x28] sm:$0xff] %vm35_vm4, %v1575_v58  ;;  %v1558_v18 = vmul.f32 -1.0, %v1542_v38  ;;  %v1496_v57 = vld [vmem:[#allocation3 + $0x30] sm:$0xff]  ;;  %v1164_v36 = vsub.f32 %v1100_v10, %v1146_v2  ;;  %v1465_v38 = vld [vmem:[#allocation2 + $0x38] sm:$0xff] }
 0x32c   :  { %v1883_v62 = vpop.eup %1882  ;;  %v1419_v45 = vld [vmem:[#allocation4 + $0x48] sm:$0xff]  ;;  %1900 = vlog2.f32 %v1496_v57  ;;  %1177 = vst.msk [vmem:[#allocation4 + $0x50] sm:$0xff] %vm35_vm4, %v1161_v27  ;;  %v1505_v6 = vld [vmem:[#allocation3 + $0x78] sm:$0xff]  ;;  %v1416_v12 = vld [vmem:[#allocation4 + $0x30] sm:$0xff]  ;;  %v1481_v10 = vsub.f32 %v1441_v29, %v1465_v38 }
 0x32d   :  { %v1885_v50 = vpop.eup %1884  ;;  %1902 = vrcp.f32 %v1409_v19  ;;  %v1574_v24 = vsel %vm1382_vm10, %v1558_v18, 0.0  ;;  %v1445_v43 = vmul.f32 %v1879_v40, %v1419_v45  ;;  %1180 = vst.msk [vmem:[#allocation4 + $0x68] sm:$0xff] %vm35_vm4, %v1164_v36  ;;  %v1144_v31 = vpop.xlane.xlu0 %1143  ;;  %v1525_v34 = vmul.f32 0.6931472, %v1883_v62  ;;  %v1468_v36 = vld [vmem:[#allocation2 + $0x50] sm:$0xff] }
 0x32e   :  { %v1887_v30 = vpop.eup %1886  ;;  %1590 = vst.msk [vmem:[%s3177_s4 + $0x20] sm:$0xff] %vm35_vm4, %v1574_v24  ;;  %1904 = vlog2.f32 %v1505_v6  ;;  %v1150_v32 = vpop.xlane.xlu1 %1149  ;;  %v1163_v7 = vsub.f32 %v1099_v15, %v1144_v31 }
 0x32f   :  { %v1889_v8 = vpop.eup %1888  ;;  %v1483_v48 = vsub.f32 %v1445_v43, %v1467_v59  ;;  %v1418_v46 = vld [vmem:[#allocation4 + $0x40] sm:$0xff]  ;;  %v1166_v41 = vsub.f32 %v1102_v47, %v1150_v32  ;;  %1906 = vlog2.f32 %v1502_v37  ;;  %v1504_v21 = vld [vmem:[#allocation3 + $0x70] sm:$0xff] }
 0x330   :  { %v1891_v60 = vpop.eup %1890  ;;  %1908 = vrcp.f32 %v1408_v0  ;;  %v1421_v35 = vld [vmem:[#allocation4 + $0x58] sm:$0xff]  ;;  %v1443_v17 = vmul.f32 %v1877_v52, %v1418_v46  ;;  %1179 = vst.msk [vmem:[#allocation4 + $0x60] sm:$0xff] %vm35_vm4, %v1163_v7  ;;  %v1523_v11 = vmul.f32 0.6931472, %v1889_v8  ;;  %v1439_v52 = vmul.f32 %v3075_v61, %v1416_v12  ;;  %v1464_v0 = vld [vmem:[#allocation2 + $0x30] sm:$0xff] }
 0x331   :  { %v1893_v63 = vpop.eup %1892  ;;  %v1547_v20 = vsub.f32 %v1483_v48, %v1525_v34  ;;  %v1449_v5 = vmul.f32 %v1885_v50, %v1421_v35  ;;  %1182 = vst.msk [vmem:[#allocation4 + $0x78] sm:$0xff] %vm35_vm4, %v1166_v41  ;;  %1910 = vlog2.f32 %v1504_v21  ;;  %v1148_v4 = vpop.xlane.xlu0 %1147  ;;  %v1529_v16 = vmul.f32 0.6931472, %v1891_v60  ;;  %v1471_v50 = vld [vmem:[#allocation2 + $0x68] sm:$0xff]  ;;  %v1473_v35 = vld [vmem:[#allocation2 + $0x78] sm:$0xff] }
 0x332   :  { %v1895_v53 = vpop.eup %1894  ;;  %v1482_v23 = vsub.f32 %v1443_v17, %v1466_v26  ;;  %v1165_v44 = vsub.f32 %v1101_v56, %v1148_v4  ;;  %v1527_v37 = vmul.f32 0.6931472, %v1893_v63  ;;  %v1480_v59 = vsub.f32 %v1439_v52, %v1464_v0  ;;  %v1470_v26 = vld [vmem:[#allocation2 + $0x60] sm:$0xff] }
 0x333   :  { %v1897_v54 = vpop.eup %1896  ;;  %v1563_v9 = vmul.f32 -1.0, %v1547_v20  ;;  %v1485_v40 = vsub.f32 %v1449_v5, %v1469_v14  ;;  %v1420_v19 = vld [vmem:[#allocation4 + $0x50] sm:$0xff]  ;;  %v1533_v55 = vmul.f32 0.6931472, %v1895_v53 }
 0x334   :  { %v1521_v58 = vmul.f32 0.6931472, %v1897_v54  ;;  %v1546_v2 = vsub.f32 %v1482_v23, %v1523_v11  ;;  %v1423_v27 = vld [vmem:[#allocation4 + $0x68] sm:$0xff]  ;;  %v1447_v18 = vmul.f32 %v3091_v42, %v1420_v19  ;;  %1181 = vst.msk [vmem:[#allocation4 + $0x70] sm:$0xff] %vm35_vm4, %v1165_v44  ;;  %v1899_v57 = vpop.eup %1898  ;;  %v1472_v44 = vld [vmem:[#allocation2 + $0x70] sm:$0xff] }
 0x335   :  { %v1579_v62 = vsel %vm1387_vm14, %v1563_v9, 0.0  ;;  %v1549_v45 = vsub.f32 %v1485_v40, %v1529_v16  ;;  %v1453_v6 = vmul.f32 %v1887_v30, %v1423_v27 }
 0x336   :  { %v1901_v61 = vpop.eup %1900  ;;  %v1545_v24 = vsub.f32 %v1481_v10, %v1521_v58  ;;  %1595 = vst.msk [vmem:[%s3177_s4 + $0x48] sm:$0xff] %vm35_vm4, %v1579_v62  ;;  %v1562_v42 = vmul.f32 -1.0, %v1546_v2  ;;  %v1484_v43 = vsub.f32 %v1447_v18, %v1468_v36 }
 0x337   :  { %v1903_v15 = vpop.eup %1902  ;;  %v1519_v31 = vmul.f32 0.6931472, %v1901_v61  ;;  %v1565_v3 = vmul.f32 -1.0, %v1549_v45  ;;  %v1487_v47 = vsub.f32 %v1453_v6, %v1471_v50  ;;  %v1422_v32 = vld [vmem:[#allocation4 + $0x60] sm:$0xff] }
 0x338   :  { %v1905_v30 = vpop.eup %1904  ;;  %v1561_v7 = vmul.f32 -1.0, %v1545_v24  ;;  %v1578_v8 = vsel %vm1386_vm13, %v1562_v42, 0.0  ;;  %v1548_v34 = vsub.f32 %v1484_v43, %v1527_v37  ;;  %v1425_v48 = vld [vmem:[#allocation4 + $0x78] sm:$0xff]  ;;  %v1451_v28 = vmul.f32 %v1899_v57, %v1422_v32 }
 0x339   :  { %v1907_v46 = vpop.eup %1906  ;;  %v1544_v41 = vsub.f32 %v1480_v59, %v1519_v31  ;;  %v1581_v21 = vsel %vm1389_vm0, %v1565_v3, 0.0  ;;  %1594 = vst.msk [vmem:[%s3177_s4 + $0x40] sm:$0xff] %vm35_vm4, %v1578_v8  ;;  %v1551_v60 = vsub.f32 %v1487_v47, %v1533_v55  ;;  %v1457_v29 = vmul.f32 %v1903_v15, %v1425_v48 }
 0x33a   :  { %v1909_v12 = vpop.eup %1908  ;;  %v1577_v13 = vsel %vm1385_vm12, %v1561_v7, 0.0  ;;  %1597 = vst.msk [vmem:[%s3177_s4 + $0x58] sm:$0xff] %vm35_vm4, %v1581_v21  ;;  %v1564_v17 = vmul.f32 -1.0, %v1548_v34  ;;  %v1537_v56 = vmul.f32 0.6931472, %v1905_v30  ;;  %v1486_v11 = vsub.f32 %v1451_v28, %v1470_v26 }
 0x33b   :  { %v1911_v63 = vpop.eup %1910  ;;  %1593 = vst.msk [vmem:[%s3177_s4 + $0x38] sm:$0xff] %vm35_vm4, %v1577_v13  ;;  %v1560_v20 = vmul.f32 -1.0, %v1544_v41  ;;  %v1567_v5 = vmul.f32 -1.0, %v1551_v60  ;;  %v1489_v4 = vsub.f32 %v1457_v29, %v1473_v35  ;;  %v1424_v39 = vld [vmem:[#allocation4 + $0x70] sm:$0xff]  ;;  %v1531_v14 = vmul.f32 0.6931472, %v1907_v46 }
 0x33c   :  { %v1580_v53 = vsel %vm1388_vm15, %v1564_v17, 0.0  ;;  %v1455_v23 = vmul.f32 %v1909_v12, %v1424_v39  ;;  %v1535_v49 = vmul.f32 0.6931472, %v1911_v63 }
 0x33d   :  { %v1576_v54 = vsel %vm1384_vm11, %v1560_v20, 0.0  ;;  %v1583_v38 = vsel %vm1391_vm1, %v1567_v5, 0.0  ;;  %1596 = vst.msk [vmem:[%s3177_s4 + $0x50] sm:$0xff] %vm35_vm4, %v1580_v53  ;;  %v1553_v9 = vsub.f32 %v1489_v4, %v1537_v56  ;;  %v1550_v51 = vsub.f32 %v1486_v11, %v1531_v14 }
 0x33e   :  { %1592 = vst.msk [vmem:[%s3177_s4 + $0x30] sm:$0xff] %vm35_vm4, %v1576_v54  ;;  %1599 = vst.msk [vmem:[%s3177_s4 + $0x68] sm:$0xff] %vm35_vm4, %v1583_v38  ;;  %v1488_v33 = vsub.f32 %v1455_v23, %v1472_v44 }
 0x33f   :  { %v1569_v52 = vmul.f32 -1.0, %v1553_v9  ;;  %v1566_v16 = vmul.f32 -1.0, %v1550_v51 }
 0x340   :  { %v1552_v40 = vsub.f32 %v1488_v33, %v1535_v49 }
 0x341   :  { %v1585_v19 = vsel %vm1393_vm3, %v1569_v52, 0.0  ;;  %v1582_v58 = vsel %vm1390_vm2, %v1566_v16, 0.0 }
 0x342   :  { %1601 = vst.msk [vmem:[%s3177_s4 + $0x78] sm:$0xff] %vm35_vm4, %v1585_v19  ;;  %v1568_v10 = vmul.f32 -1.0, %v1552_v40  ;;  %1598 = vst.msk [vmem:[%s3177_s4 + $0x60] sm:$0xff] %vm35_vm4, %v1582_v58 }
 0x344   :  { %v1584_v2 = vsel %vm1392_vm8, %v1568_v10, 0.0 }
 0x345   :  { %1600 = vst.msk [vmem:[%s3177_s4 + $0x70] sm:$0xff] %vm35_vm4, %v1584_v2 }
 0x346   :  { %1606 = vsyncpa [#allocation8], 1 }

</bundles_post_ra>
